<compile_context>
chip_gen: v6e
topology: v6e:2x2x1
jax: 0.10.0
libtpu: 0.0.40
codegen_flags: <defaults>
</compile_context>

<pallas_src>
import functools
import math

import jax
import jax.numpy as jnp
import numpy as np
from jax.experimental import pallas as pl
from jax.experimental.pallas import tpu as pltpu


# -----------------------------------------------------------------------------
# Host-side helpers
# -----------------------------------------------------------------------------
def _deinterleave_perm(num_heads, head_dim):
    """Row perm mapping Megatron fused per-head [q|k|v] rows -> [Q|K|V] blocks."""
    idx = np.arange(3 * num_heads * head_dim).reshape(num_heads, 3, head_dim)
    return np.transpose(idx, (1, 0, 2)).reshape(-1)


def _chip_vmem_bytes():
    """Physical per-core VMEM (128 MiB on v5e/v6e, 64 MiB on v7x)."""
    try:
        return int(pltpu.get_tpu_info().vmem_capacity_bytes)
    except Exception:
        return 128 << 20


def _pick_block_batch(batch, seq_len, vmem_bytes, max_bb=64):
    """Choose batch rows per grid step.

    Prefer bb*seq_len >= 256 (fills the 256-wide MXU M dim on v6e/v7x) while
    keeping enough grid steps: >= 4 on v7x (2 TensorCores each need >= 2 steps
    for double-buffering), >= 2 otherwise.
    """
    min_grid = 4 if vmem_bytes <= (64 << 20) else 2
    target_m = 256
    divs = [d for d in range(1, min(batch, max_bb) + 1) if batch % d == 0]
    ok = [d for d in divs if batch // d >= min_grid]
    if not ok:
        ok = [d for d in divs if batch // d >= 2] or divs
    hit = [d for d in ok if d * seq_len >= target_m]
    return min(hit) if hit else max(ok)


def _vmem_budget_bytes(bb, S, H, num_heads, act_bytes, vmem_phys):
    f32, bf16 = 4, 2
    hd = H // num_heads
    # Double-buffered per-step streams: x and out only.
    streams = 2 * 2 * (bb * S * H * act_bytes)
    # Constant-index_map operands (fetched once): mask, W_qkv^T, b_qkv, W_o^T, b_o.
    # TODO(synk): use pipeline_mode=pl.Buffered(1) for these once supported for
    # constant blocks; counted single-buffered here.
    consts = (S * S * f32 + H * 3 * H * bf16 + 3 * H * f32 + H * H * bf16 + H * f32)
    # In-kernel temporaries (rough simultaneously-live upper bound).
    scratch = (bb * S * 3 * H * (f32 + bf16)           # qkv fp32 acc + bf16 copy
               + 3 * bb * num_heads * S * hd * bf16    # q, k, v
               + 3 * bb * num_heads * S * S * f32      # scores / exp / probs
               + bb * num_heads * S * hd * f32         # ctx
               + 2 * bb * S * H * f32)                 # ctx_all / out
    budget = int(1.4 * (streams + consts + scratch)) + (4 << 20)
    cap = min(100 << 20, int(0.75 * vmem_phys))
    return max(min(32 << 20, cap), min(budget, cap))


# -----------------------------------------------------------------------------
# Pallas kernel: one block of `block_b` batch/window elements per grid step.
# -----------------------------------------------------------------------------
def _swin_attention_kernel(x_ref, mask_ref, wqkv_ref, bqkv_ref, wo_ref, bo_ref,
                           out_ref, *, num_heads, head_dim, block_b, seq_len):
    S = seq_len
    H = num_heads * head_dim
    bb = block_b
    G = bb * num_heads

    x_in = x_ref[...].reshape(bb * S, H)                              # (bb*S, H)

    # Fused QKV projection: bf16 MXU inputs, fp32 accumulation.  Weight is
    # pre-transposed, de-interleaved ([Q|K|V], head-major) and 1/sqrt(head_dim)
    # is already folded into the Q columns host-side.
    qkv = jnp.dot(x_in.astype(jnp.bfloat16), wqkv_ref[...],
                  preferred_element_type=jnp.float32) + bqkv_ref[...]  # (bb*S, 3H)
    qkv = qkv.astype(jnp.bfloat16)                                     # cast ONCE

    def split_heads(cols):                                             # (bb*S, H)
        t = cols.reshape(bb, S, num_heads, head_dim)
        return jnp.transpose(t, (0, 2, 1, 3)).reshape(G, S, head_dim)  # (G, S, hd)

    q = split_heads(qkv[:, 0 * H:1 * H])
    k = split_heads(qkv[:, 1 * H:2 * H])
    v = split_heads(qkv[:, 2 * H:3 * H])

    # One batched MXU contraction over all (batch, head) groups.
    scores = jnp.einsum("gqd,gkd->gqk", q, k,
                        preferred_element_type=jnp.float32)            # (G, S, S)

    # Padding mask with masked_fill semantics (exactly like the reference):
    # masked positions are REPLACED by -10000 (single broadcast per step).
    masked = mask_ref[...] > jnp.float32(0.5)                          # (S, S) bool
    scores = jnp.where(masked[None, :, :], jnp.float32(-10000.0), scores)

    m = jnp.max(scores, axis=-1, keepdims=True)
    e = jnp.exp(scores - m)
    denom = jnp.sum(e, axis=-1, keepdims=True)
    probs = e * pl.reciprocal(denom, approx=True)                      # fp32 softmax

    ctx = jnp.einsum("gqk,gkd->gqd", probs.astype(jnp.bfloat16), v,
                     preferred_element_type=jnp.float32)               # (G, S, hd)
    ctx_all = jnp.transpose(ctx.reshape(bb, num_heads, S, head_dim),
                            (0, 2, 1, 3)).reshape(bb * S, H)           # (bb*S, H)

    # Output (row-parallel) projection; bias added afterwards (skip_bias_add).
    out = jnp.dot(ctx_all.astype(jnp.bfloat16), wo_ref[...],
                  preferred_element_type=jnp.float32) + bo_ref[...]

    # drop_path: identity (config.drop_path_rate == 0 / eval mode).
    # TODO(synk): stochastic SwinDropPath for training mode is not implemented.
    out = out + x_in.astype(jnp.float32)                               # fp32 residual
    out_ref[...] = out.reshape(bb, S, H).astype(out_ref.dtype)


# -----------------------------------------------------------------------------
# Wrappers
# -----------------------------------------------------------------------------
def swin_attention_tp_forward_bsh(x_bsh, attention_mask, params, num_heads,
                                  block_batch=None):
    """Batch-major entry point: x_bsh (B, S, H) -> (B, S, H)."""
    B, S, H = x_bsh.shape
    assert H % num_heads == 0
    head_dim = H // num_heads
    act_bytes = jnp.dtype(x_bsh.dtype).itemsize

    # Sublane-align the sequence length (Swin window 7*7 = 49 -> 56): pad rows
    # host-side, mask the pad keys, drop the pad query rows afterwards.
    S_pad = ((S + 7) // 8) * 8
    if S_pad != S:
        x_bsh = jnp.pad(x_bsh, ((0, 0), (0, S_pad - S), (0, 0)))

    if attention_mask is None:
        mask2d = jnp.zeros((S, S), dtype=jnp.float32)
    else:
        # Single (S,S) padding mask shared by every batch/window element;
        # re-used by all grid steps via a constant index_map (no tiling).
        mask2d = attention_mask.reshape(S, S).astype(jnp.float32)
    if S_pad != S:
        full = jnp.ones((S_pad, S_pad), dtype=jnp.float32)             # pad = masked
        mask2d = full.at[:S, :S].set(mask2d)

    # One-time host/XLA-side weight repack: de-interleave Megatron fused QKV
    # rows into contiguous [Q|K|V] blocks, fold 1/sqrt(head_dim) into the Q
    # block, pre-transpose, cast to bf16 for the MXU.
    perm = _deinterleave_perm(num_heads, head_dim)
    scale = 1.0 / math.sqrt(head_dim)
    row_scale = jnp.concatenate(
        [jnp.full((H,), scale, jnp.float32), jnp.ones((2 * H,), jnp.float32)])
    wqkv_p = jnp.asarray(params["wqkv"], jnp.float32)[perm, :] * row_scale[:, None]
    bqkv_p = jnp.asarray(params["bqkv"], jnp.float32)[perm] * row_scale
    wqkv_t = wqkv_p.T.astype(jnp.bfloat16)                             # (H, 3H)
    bqkv = bqkv_p.reshape(1, 3 * H).astype(jnp.float32)
    wo_t = jnp.asarray(params["wo"], jnp.float32).T.astype(jnp.bfloat16)  # (H, H)
    bo = jnp.asarray(params["bo"], jnp.float32).reshape(1, H)

    vmem_phys = _chip_vmem_bytes()
    bb = (block_batch if block_batch is not None
          else _pick_block_batch(B, S_pad, vmem_phys))
    assert B % bb == 0
    # Shrink bb if the working set would exceed the per-core VMEM cap (v7x: 64 MiB).
    cap = min(100 << 20, int(0.75 * vmem_phys))
    while bb > 1 and _vmem_budget_bytes(bb, S_pad, H, num_heads,
                                        act_bytes, vmem_phys) > cap:
        bb = max(d for d in range(1, bb) if B % d == 0)
    grid_b = B // bb

    kernel = functools.partial(_swin_attention_kernel, num_heads=num_heads,
                               head_dim=head_dim, block_b=bb, seq_len=S_pad)

    out = pl.pallas_call(
        kernel,
        out_shape=jax.ShapeDtypeStruct((B, S_pad, H), x_bsh.dtype),
        grid_spec=pltpu.PrefetchScalarGridSpec(
            num_scalar_prefetch=0,
            grid=(grid_b,),
            in_specs=[
                pl.BlockSpec((bb, S_pad, H), lambda g: (g, 0, 0)),      # x stream
                pl.BlockSpec((S_pad, S_pad), lambda g: (0, 0)),         # mask (shared)
                pl.BlockSpec((H, 3 * H), lambda g: (0, 0)),             # W_qkv^T bf16
                pl.BlockSpec((1, 3 * H), lambda g: (0, 0)),             # b_qkv
                pl.BlockSpec((H, H), lambda g: (0, 0)),                 # W_o^T bf16
                pl.BlockSpec((1, H), lambda g: (0, 0)),                 # b_o
            ],
            out_specs=pl.BlockSpec((bb, S_pad, H), lambda g: (g, 0, 0)),
        ),
        compiler_params=pltpu.CompilerParams(
            dimension_semantics=("parallel",),
            vmem_limit_bytes=_vmem_budget_bytes(bb, S_pad, H, num_heads,
                                                act_bytes, vmem_phys),
        ),
    )(x_bsh, mask2d, wqkv_t, bqkv, wo_t, bo)

    if S_pad != S:
        out = out[:, :S, :]
    return out


def swin_attention_tp_forward(hidden_states, attention_mask, params, num_heads,
                              batch_size=None, block_batch=None):
    """Module-faithful entry point: hidden_states (S, B, H) -> (S, B, H).

    `batch_size` (used by the PyTorch module only to repeat the mask) is
    accepted for API compatibility but unused: the single (S,S) mask is shared
    across the batch inside the kernel.  Batch-major callers should use
    `swin_attention_tp_forward_bsh` directly and skip both transposes.
    """
    del batch_size
    x_bsh = jnp.transpose(hidden_states, (1, 0, 2))                    # (B, S, H)
    out_bsh = swin_attention_tp_forward_bsh(x_bsh, attention_mask, params,
                                            num_heads, block_batch=block_batch)
    return jnp.transpose(out_bsh, (1, 0, 2))                           # (S, B, H)


# -----------------------------------------------------------------------------
# Pure-JAX reference (mirrors the module math with the ORIGINAL fused layout).
# -----------------------------------------------------------------------------
def _reference_forward(hidden_states, attention_mask, params, num_heads, batch_size):
    S, B, H = hidden_states.shape
    hd = H // num_heads
    x = hidden_states.astype(jnp.float32)
    if attention_mask is None:
        mask = jnp.zeros((B, 1, S, S), dtype=bool)
    else:
        mask = jnp.tile(attention_mask, (batch_size, 1, 1, 1))
    qkv = jnp.einsum("sbh,oh->sbo", x, params["wqkv"]) + params["bqkv"]
    qkv = qkv.reshape(S, B, num_heads, 3 * hd)
    q, k, v = qkv[..., :hd], qkv[..., hd:2 * hd], qkv[..., 2 * hd:]
    scores = jnp.einsum("sbnd,tbnd->bnst", q, k) / np.sqrt(hd)
    scores = jnp.where(mask, -10000.0, scores)
    probs = jax.nn.softmax(scores, axis=-1)
    ctx = jnp.einsum("bnst,tbnd->sbnd", probs, v).reshape(S, B, H)
    out = jnp.einsum("sbh,oh->sbo", ctx, params["wo"]) + params["bo"]
    return out + x


if __name__ == "__main__":
    # Small shapes consistent with the module: (seq_len, bsz, hidden)
    S, B, H = 8, 4, 32
    NUM_HEADS = 4

    key = jax.random.PRNGKey(0)
    k_x, k_m, k_wqkv, k_bqkv, k_wo, k_bo = jax.random.split(key, 6)

    hidden_states = jax.random.normal(k_x, (S, B, H), dtype=jnp.float32)
    # (1,1,S,S) bool padding mask shared by the batch (as in the module); keep
    # the diagonal unmasked (a query always attends to itself).
    attention_mask = jax.random.bernoulli(k_m, 0.25, (1, 1, S, S))
    eye = jnp.eye(S, dtype=bool)[None, None]
    attention_mask = jnp.logical_and(attention_mask, jnp.logical_not(eye))

    params = {
        "wqkv": 0.02 * jax.random.normal(k_wqkv, (3 * H, H), dtype=jnp.float32),
        "bqkv": 0.01 * jax.random.normal(k_bqkv, (3 * H,), dtype=jnp.float32),
        "wo": 0.02 * jax.random.normal(k_wo, (H, H), dtype=jnp.float32),
        "bo": 0.01 * jax.random.normal(k_bo, (H,), dtype=jnp.float32),
    }

    out = swin_attention_tp_forward(hidden_states, attention_mask, params,
                                    NUM_HEADS, batch_size=B)
    out = jax.block_until_ready(out)

    ref = _reference_forward(hidden_states, attention_mask, params, NUM_HEADS, B)
    # bf16 MXU inputs (fp32 accumulate / fp32 softmax) -> ~1e-3 level error.
    np.testing.assert_allclose(np.asarray(out), np.asarray(ref),
                               rtol=2e-2, atol=2e-2)
    print("KERNEL_OK")
</pallas_src>

<mosaic_0001>
module attributes {stable_mosaic.version = 11 : i64} {
  func.func @_swin_attention_kernel(%arg0: i32, %arg1: memref<2x8x32xf32, #tpu.memory_space<vmem>>, %arg2: memref<8x8xf32, #tpu.memory_space<vmem>>, %arg3: memref<32x96xbf16, #tpu.memory_space<vmem>>, %arg4: memref<1x96xf32, #tpu.memory_space<vmem>>, %arg5: memref<32x32xbf16, #tpu.memory_space<vmem>>, %arg6: memref<1x32xf32, #tpu.memory_space<vmem>>, %arg7: memref<2x8x32xf32, #tpu.memory_space<vmem>>) attributes {dimension_semantics = [#tpu.dimension_semantics<parallel>], iteration_bounds = array<i64: 2>, scalar_prefetch = 0 : i64, scratch_operands = 0 : i64, tpu.core_type = #tpu.core_type<tc>, window_params = [{transform_indices = @transform_0, window_bounds = array<i64: 2, 8, 32>}, {pipeline_mode = #tpu.pipeline_mode<synchronous>, transform_indices = @transform_1, window_bounds = array<i64: 8, 8>}, {pipeline_mode = #tpu.pipeline_mode<synchronous>, transform_indices = @transform_2, window_bounds = array<i64: 32, 96>}, {pipeline_mode = #tpu.pipeline_mode<synchronous>, transform_indices = @transform_3, window_bounds = array<i64: 1, 96>}, {pipeline_mode = #tpu.pipeline_mode<synchronous>, transform_indices = @transform_4, window_bounds = array<i64: 32, 32>}, {pipeline_mode = #tpu.pipeline_mode<synchronous>, transform_indices = @transform_5, window_bounds = array<i64: 1, 32>}, {transform_indices = @transform_6, window_bounds = array<i64: 2, 8, 32>}]} {
    %c0 = arith.constant 0 : index
    %c0_0 = arith.constant 0 : index
    %c0_1 = arith.constant 0 : index
    %0 = vector.load %arg1[%c0, %c0_0, %c0_1] : memref<2x8x32xf32, #tpu.memory_space<vmem>>, vector<2x8x32xf32>
    %1 = vector.shape_cast %0 : vector<2x8x32xf32> to vector<16x32xf32>
    %2 = arith.truncf %1 : vector<16x32xf32> to vector<16x32xbf16>
    %c0_2 = arith.constant 0 : index
    %c0_3 = arith.constant 0 : index
    %3 = vector.load %arg3[%c0_2, %c0_3] : memref<32x96xbf16, #tpu.memory_space<vmem>>, vector<32x96xbf16>
    %cst = arith.constant dense<0.000000e+00> : vector<16x96xf32>
    %4 = tpu.matmul %2, %3, %cst {dimension_numbers = #tpu.dot_dimension_numbers<[1], [0], [0], [1], [0, 0, 1, 1], [], []>} : vector<16x32xbf16>, vector<32x96xbf16>, vector<16x96xf32> -> vector<16x96xf32>
    %c0_4 = arith.constant 0 : index
    %c0_5 = arith.constant 0 : index
    %5 = vector.load %arg4[%c0_4, %c0_5] : memref<1x96xf32, #tpu.memory_space<vmem>>, vector<1x96xf32>
    %6 = vector.broadcast %5 : vector<1x96xf32> to vector<16x96xf32>
    %7 = arith.addf %4, %6 : vector<16x96xf32>
    %8 = arith.truncf %7 : vector<16x96xf32> to vector<16x96xbf16>
    %9 = vector.extract_strided_slice %8 {offsets = [0, 0], sizes = [16, 32], strides = [1, 1]} : vector<16x96xbf16> to vector<16x32xbf16>
    %10 = vector.shape_cast %9 : vector<16x32xbf16> to vector<2x8x4x8xbf16>
    %11 = tpu.transpose %10, [0, 2, 1, 3] : vector<2x8x4x8xbf16> -> vector<2x4x8x8xbf16>
    %12 = vector.shape_cast %11 : vector<2x4x8x8xbf16> to vector<8x8x8xbf16>
    %13 = vector.extract_strided_slice %8 {offsets = [0, 32], sizes = [16, 32], strides = [1, 1]} : vector<16x96xbf16> to vector<16x32xbf16>
    %14 = vector.shape_cast %13 : vector<16x32xbf16> to vector<2x8x4x8xbf16>
    %15 = tpu.transpose %14, [0, 2, 1, 3] : vector<2x8x4x8xbf16> -> vector<2x4x8x8xbf16>
    %16 = vector.shape_cast %15 : vector<2x4x8x8xbf16> to vector<8x8x8xbf16>
    %17 = vector.extract_strided_slice %8 {offsets = [0, 64], sizes = [16, 32], strides = [1, 1]} : vector<16x96xbf16> to vector<16x32xbf16>
    %18 = vector.shape_cast %17 : vector<16x32xbf16> to vector<2x8x4x8xbf16>
    %19 = tpu.transpose %18, [0, 2, 1, 3] : vector<2x8x4x8xbf16> -> vector<2x4x8x8xbf16>
    %20 = vector.shape_cast %19 : vector<2x4x8x8xbf16> to vector<8x8x8xbf16>
    "tpu.trace_start"() <{level = 10 : i32, message = "gqd,gkd->gqk"}> : () -> ()
    %cst_6 = arith.constant dense<0.000000e+00> : vector<8x8x8xf32>
    %21 = tpu.matmul %12, %16, %cst_6 {dimension_numbers = #tpu.dot_dimension_numbers<[2], [2], [1], [1], [0, 0, 0, 1, 1, 1], [0], [0]>} : vector<8x8x8xbf16>, vector<8x8x8xbf16>, vector<8x8x8xf32> -> vector<8x8x8xf32>
    "tpu.trace_stop"() : () -> ()
    %c0_7 = arith.constant 0 : index
    %c0_8 = arith.constant 0 : index
    %22 = vector.load %arg2[%c0_7, %c0_8] : memref<8x8xf32, #tpu.memory_space<vmem>>, vector<8x8xf32>
    %cst_9 = arith.constant 5.000000e-01 : f32
    %23 = vector.broadcast %cst_9 : f32 to vector<8x8xf32>
    %24 = arith.cmpf ogt, %22, %23 : vector<8x8xf32>
    %25 = vector.shape_cast %24 : vector<8x8xi1> to vector<1x8x8xi1>
    %cst_10 = arith.constant -1.000000e+04 : f32
    %26 = vector.shape_cast %25 : vector<1x8x8xi1> to vector<1x8x8xi1>
    %27 = vector.broadcast %26 : vector<1x8x8xi1> to vector<8x8x8xi1>
    %28 = vector.broadcast %cst_10 : f32 to vector<8x8x8xf32>
    %29 = arith.select %27, %28, %21 : vector<8x8x8xi1>, vector<8x8x8xf32>
    %cst_11 = arith.constant dense<0xFF800000> : vector<8x8xf32>
    %30 = vector.multi_reduction <maximumf>, %29, %cst_11 [2] : vector<8x8x8xf32> to vector<8x8xf32>
    %31 = vector.shape_cast %30 : vector<8x8xf32> to vector<8x8x1xf32>
    %32 = vector.broadcast %31 : vector<8x8x1xf32> to vector<8x8x8xf32>
    %33 = arith.subf %29, %32 : vector<8x8x8xf32>
    %34 = math.exp %33 : vector<8x8x8xf32>
    %cst_12 = arith.constant dense<0.000000e+00> : vector<8x8xf32>
    %35 = vector.multi_reduction <add>, %34, %cst_12 [2] : vector<8x8x8xf32> to vector<8x8xf32>
    %36 = vector.shape_cast %35 : vector<8x8xf32> to vector<8x8x1xf32>
    %37 = tpu.reciprocal %36 {approx = true} : vector<8x8x1xf32> -> vector<8x8x1xf32>
    %38 = vector.broadcast %37 : vector<8x8x1xf32> to vector<8x8x8xf32>
    %39 = arith.mulf %34, %38 : vector<8x8x8xf32>
    %40 = arith.truncf %39 : vector<8x8x8xf32> to vector<8x8x8xbf16>
    "tpu.trace_start"() <{level = 10 : i32, message = "gqk,gkd->gqd"}> : () -> ()
    %cst_13 = arith.constant dense<0.000000e+00> : vector<8x8x8xf32>
    %41 = tpu.matmul %40, %20, %cst_13 {dimension_numbers = #tpu.dot_dimension_numbers<[2], [1], [1], [2], [0, 0, 0, 1, 1, 2], [0], [0]>} : vector<8x8x8xbf16>, vector<8x8x8xbf16>, vector<8x8x8xf32> -> vector<8x8x8xf32>
    "tpu.trace_stop"() : () -> ()
    %42 = vector.shape_cast %41 : vector<8x8x8xf32> to vector<2x4x8x8xf32>
    %43 = tpu.transpose %42, [0, 2, 1, 3] : vector<2x4x8x8xf32> -> vector<2x8x4x8xf32>
    %44 = vector.shape_cast %43 : vector<2x8x4x8xf32> to vector<16x32xf32>
    %45 = arith.truncf %44 : vector<16x32xf32> to vector<16x32xbf16>
    %c0_14 = arith.constant 0 : index
    %c0_15 = arith.constant 0 : index
    %46 = vector.load %arg5[%c0_14, %c0_15] : memref<32x32xbf16, #tpu.memory_space<vmem>>, vector<32x32xbf16>
    %cst_16 = arith.constant dense<0.000000e+00> : vector<16x32xf32>
    %47 = tpu.matmul %45, %46, %cst_16 {dimension_numbers = #tpu.dot_dimension_numbers<[1], [0], [0], [1], [0, 0, 1, 1], [], []>} : vector<16x32xbf16>, vector<32x32xbf16>, vector<16x32xf32> -> vector<16x32xf32>
    %c0_17 = arith.constant 0 : index
    %c0_18 = arith.constant 0 : index
    %48 = vector.load %arg6[%c0_17, %c0_18] : memref<1x32xf32, #tpu.memory_space<vmem>>, vector<1x32xf32>
    %49 = vector.broadcast %48 : vector<1x32xf32> to vector<16x32xf32>
    %50 = arith.addf %47, %49 : vector<16x32xf32>
    %51 = arith.addf %50, %1 : vector<16x32xf32>
    %52 = vector.shape_cast %51 : vector<16x32xf32> to vector<2x8x32xf32>
    %c0_19 = arith.constant 0 : index
    %c0_20 = arith.constant 0 : index
    %c0_21 = arith.constant 0 : index
    %53 = vector.load %arg7[%c0_19, %c0_20, %c0_21] : memref<2x8x32xf32, #tpu.memory_space<vmem>>, vector<2x8x32xf32>
    tpu.vector_store %arg7[%c0_19, %c0_20, %c0_21], %52 {strides = array<i32>} : memref<2x8x32xf32, #tpu.memory_space<vmem>>, vector<2x8x32xf32>,
    return
  }
  func.func @transform_0(%arg0: i32) -> (i32, i32, i32) {
    %c0_i32 = arith.constant 0 : i32
    %c0_i32_0 = arith.constant 0 : i32
    %c0_i32_1 = arith.constant 0 : i32
    return %arg0, %c0_i32, %c0_i32_0 : i32, i32, i32
  }
  func.func @transform_1(%arg0: i32) -> (i32, i32) {
    %c0_i32 = arith.constant 0 : i32
    %c0_i32_0 = arith.constant 0 : i32
    %c0_i32_1 = arith.constant 0 : i32
    return %c0_i32, %c0_i32_0 : i32, i32
  }
  func.func @transform_2(%arg0: i32) -> (i32, i32) {
    %c0_i32 = arith.constant 0 : i32
    %c0_i32_0 = arith.constant 0 : i32
    %c0_i32_1 = arith.constant 0 : i32
    return %c0_i32, %c0_i32_0 : i32, i32
  }
  func.func @transform_3(%arg0: i32) -> (i32, i32) {
    %c0_i32 = arith.constant 0 : i32
    %c0_i32_0 = arith.constant 0 : i32
    %c0_i32_1 = arith.constant 0 : i32
    return %c0_i32, %c0_i32_0 : i32, i32
  }
  func.func @transform_4(%arg0: i32) -> (i32, i32) {
    %c0_i32 = arith.constant 0 : i32
    %c0_i32_0 = arith.constant 0 : i32
    %c0_i32_1 = arith.constant 0 : i32
    return %c0_i32, %c0_i32_0 : i32, i32
  }
  func.func @transform_5(%arg0: i32) -> (i32, i32) {
    %c0_i32 = arith.constant 0 : i32
    %c0_i32_0 = arith.constant 0 : i32
    %c0_i32_1 = arith.constant 0 : i32
    return %c0_i32, %c0_i32_0 : i32, i32
  }
  func.func @transform_6(%arg0: i32) -> (i32, i32, i32) {
    %c0_i32 = arith.constant 0 : i32
    %c0_i32_0 = arith.constant 0 : i32
    %c0_i32_1 = arith.constant 0 : i32
    return %arg0, %c0_i32, %c0_i32_0 : i32, i32, i32
  }
}

</mosaic_0001>

<bundles_post_ra>
// kernel: tpu_custom_call.1
= control target key start
LH: loop header
LB: loop body
LE: loop exit
PB: predicated region body
PF: predicated region fallthrough
CT: control target
= control target key end

     0   :  { %11 = vsyncpa [#allocation3], 0  ;;  %s3754_s0 = inlined_call_operand.hbm [shape: f32[4,8,32], index: 0, kind: input, shape index: {}]   ;;  %s3755_s1 = inlined_call_operand.hbm [shape: f32[8,8], index: 1, kind: input, shape index: {}]   ;;  %s3756_s2 = inlined_call_operand.hbm [shape: bf16[32,96], index: 2, kind: input, shape index: {}]   ;;  %s3757_s3 = inlined_call_operand.vmem [shape: f32[1,96], index: 3, kind: input, shape index: {}]   ;;  %s3758_s4 = inlined_call_operand.hbm [shape: bf16[32,32], index: 4, kind: input, shape index: {}]   ;;  %s3759_s5 = inlined_call_operand.vmem [shape: f32[1,32], index: 5, kind: input, shape index: {}]   ;;  %s3760_s6 = inlined_call_operand.hbm [shape: f32[4,8,32], index: 6, kind: output, shape index: {}]  }
   0x1   :  { %13 = vsyncpa [#allocation3 + $0x1], 0 }
   0x2   :  { %14 = vsyncpa [#allocation6], 0 }
   0x3   :  { %15 = vsyncpa [#allocation9], 0 }
   0x4   :  { %16 = vsyncpa [#allocation4], 0 }
   0x5   :  { %18 = vsyncpa [#allocation4 + $0x1], 0  ;;  %s3168_s21 = smov 0   ;;  %s3170_s22 = smov 0  }
   0x6   :  { %s3172_s23 = smov 0   ;;  %s3174_s24 = smov 0  }
   0x7 LB: > { %s3189_s25 = sadd.s32 4294967295, %s3108_s24   ;;  %s2570_s26 = sadd.s32 4294967294, %s3108_s24   ;;  %s3108_s24 = sphi %s3174_s24, %s3784_s24   ;;  %s3104_s23 = sphi %s3172_s23, %s3783_s23   ;;  %s3100_s22 = sphi %s3170_s22, %s3782_s22   ;;  %s3096_s21 = sphi %s3168_s21, %s3781_s21  }
   0x8   : > { %p44_p0 = scmp.ne.s32.totalorder %s3100_s22, %s3096_s21  ;;  %p3761_p1 = scmp.eq.s32.totalorder %s3189_s25, 0 }
   0x9   : > { %p179_p3 = scmp.eq.s32.totalorder %s2570_s26, 1  ;;  %p2571_p5 = scmp.ge.s32.totalorder %s3108_s24, 1 }
   0xa   : > { %p3198_p4 = por %p3761_p1, %p44_p0  ;;  %p186_p7 = scmp.lt.s32.totalorder %s3108_s24, 3 }
   0xb   : > { %p3203_p6 = por %p179_p3, %p44_p0  ;;  %s3110_s30 = smov [#allocation5]  }
   0xc   : > { %s3765_s27 = scalar_select %p3198_p4, 1, 0 }
   0xd   : > { %s3766_s28 = scalar_select %p3203_p6, 1, 0 }
   0xe   : > { %p3208_p8 = pnand %p2571_p5, %p186_p7  ;;  %s199_s7 = sshll.u32 %s3110_s30, 4  ;;  %s200_s7 = int_to_ptr.vmem [resolvable:$true] %s199_s7 }
   0xf   : > { %s3111_s8 = smov [#allocation7]   ;;  %s3112_s11 = smov [#allocation8]  }
  0x10   : > { %s3767_s29 = scalar_select %p3208_p8, 1, 0 }
  0x11   : > { %p2798_p10 = pneg %p3208_p8  ;;  %s209_s9 = sshll.u32 %s3111_s8, 4  ;;  %s210_s9 = int_to_ptr.vmem [resolvable:$true] %s209_s9 }
  0x12   : > { %s225_s12 = sshll.u32 %s3112_s11, 4  ;;  %s2941_s13 = scalar_lea.vmem %s200_s7, 128  ;;  %s226_s12 = int_to_ptr.vmem [resolvable:$true] %s225_s12 }
  0x13   : > { %p3217_p11 = pnand %p2798_p10, %p3761_p1  ;;  %p2942_p13 = scmp.ne.s32.totalorder %s200_s7, %s2941_s13 }
  0x14   : > { %p2949_p5 = scmp.lt.s32.totalorder %s200_s7, %s200_s7  ;;  %p2950_p7 = scmp.lt.s32.totalorder %s2941_s13, %s2941_s13 }
  0x15   : > { %p2932_p12 = pneg %p3217_p11 }
  0x16   : > { %p2951_p9 = por %p2950_p7, %p2949_p5 }
  0x17   : > { %p2944_p0 = pnand %p2942_p13, %p2932_p12 }
  0x19   : > { %p2945_p3 = pneg %p2944_p0 }
  0x1b   : > { %p2952_p10 = pnand %p2951_p9, %p2945_p3 }
  0x1d   : > { %2955 = shalt.err (!%p2952_p10)
}
  0x1e   : > { %2801 = dma.hbm_to_vmem [thread:$0]  (!%p3217_p11), %s3755_s1, 128, %s200_s7, [#allocation6]  }
  0x1f   : > { %s2967_s16 = scalar_lea.vmem %s210_s9, 256  ;;  %p2975_p13 = scmp.lt.s32.totalorder %s210_s9, %s210_s9 }
  0x20   : > { %p2968_p1 = scmp.ne.s32.totalorder %s210_s9, %s2967_s16  ;;  %p2976_p0 = scmp.lt.s32.totalorder %s2967_s16, %s2967_s16 }
  0x22   : > { %p2970_p2 = pnand %p2968_p1, %p2932_p12  ;;  %p2977_p4 = por %p2976_p0, %p2975_p13 }
  0x24   : > { %p2971_p6 = pneg %p2970_p2 }
  0x26   : > { %p2978_p8 = pnand %p2977_p4, %p2971_p6 }
  0x28   : > { %2981 = shalt.err (!%p2978_p8)
}
  0x29   : > { %s3113_s17 = smov 64   ;;  %s3114_s18 = smov 4  }
  0x2a   : > { %2804 = dma.hbm_to_vmem [thread:$0]  (!%p3217_p11), %s3756_s2, 256, %s210_s9, [#allocation6], %s3113_s17, %s3113_s17, %s3114_s18  }
  0x2b   : > { %s2993_s26 = scalar_lea.vmem %s226_s12, 256  ;;  %p3001_p3 = scmp.lt.s32.totalorder %s226_s12, %s226_s12 }
  0x2c   : > { %p2994_p9 = scmp.ne.s32.totalorder %s226_s12, %s2993_s26  ;;  %p3002_p5 = scmp.lt.s32.totalorder %s2993_s26, %s2993_s26 }
  0x2e   : > { %p2996_p1 = pnand %p2994_p9, %p2932_p12  ;;  %p3003_p4 = por %p3002_p5, %p3001_p3 }
  0x30   : > { %p2997_p2 = pneg %p2996_p1 }
  0x32   : > { %p3004_p6 = pnand %p3003_p4, %p2997_p2 }
  0x34   : > { %3007 = shalt.err (!%p3004_p6)
}
  0x35   : > { %2807 = dma.hbm_to_vmem [thread:$0]  (!%p3217_p11), %s3758_s4, 256, %s226_s12, [#allocation9], %s3113_s17, %s3113_s17, %s3114_s18  }
  0x36   : > { %s3248_s8 = sadd.s32 1, %s3108_s24   ;;  %s31_s10 = sadd.s32 1, %s3104_s23 }
  0x37   : > { %s28_s9 = ssub.s32 %s3108_s24, %s3248_s8  ;;  %p38_p12 = scmp.ne.s32.totalorder %s3104_s23, %s3100_s22 }
  0x38   : > { %p29_p8 = scmp.eq.s32.totalorder %s28_s9, 0  ;;  %p39_p7 = scmp.eq.s32.totalorder %s3108_s24, 0 }
  0x39   : > { %p2819_p10 = scmp.lt.s32.totalorder %s3108_s24, 2  ;;  %p3769_p0 = scmp.eq.s32.totalorder %s3189_s25, 1 }
  0x3a   : > { %s3258_s11 = scalar_select %p29_p8, %s3104_s23, %s31_s10  }
  0x3b   : > { %p40_p13 = por %p39_p7, %p38_p12  ;;  %p3262_p9 = por %p3769_p0, %p38_p12 }
  0x3c   : > { %s242_s14 = sand.u32 1, %s3104_s23   ;;  %s2630_s15 = sshll.u32 %s3108_s24, 8 }
  0x3d   : > { %s3770_s13 = scalar_select %p3262_p9, 1, 0 }
  0x3e   : > { %s2576_s12 = sshll.u32 %s242_s14, 4  ;;  %s3271_s18 = scalar_lea.hbm %s3754_s0, %s2630_s15 }
  0x3f   : > { %s246_s19 = scalar_lea.vmem [#allocation2], %s2576_s12  ;;  %p3273_p11 = pnand %p2819_p10, %p40_p13 }
  0x40   : > { %s253_s20 = sshll.u32 %s246_s19, 4  ;;  %s3279_s30 = scalar_lea.sflag [#allocation3], %s242_s14  ;;  %s3277_s20 = int_to_ptr.vmem [resolvable:$true] %s253_s20 }
  0x41   : > { %s3008_s7 = scalar_lea.hbm %s3271_s18, 256  ;;  %p3010_p2 = pneg %p3273_p11 }
  0x42   : > { %p3009_p1 = scmp.ne.s32.totalorder %s3271_s18, %s3008_s7  ;;  %s3013_s15 = scalar_lea.hbm %s3754_s0, 512 }
  0x43   : > { %p3014_p4 = scmp.lt.s32.totalorder %s3271_s18, %s3754_s0  ;;  %p3015_p6 = scmp.lt.s32.totalorder %s3013_s15, %s3008_s7 }
  0x44   : > { %p3011_p3 = pnand %p3010_p2, %p3009_p1 }
  0x45   : > { %p3016_p8 = por %p3015_p6, %p3014_p4 }
  0x46   : > { %p3012_p5 = pneg %p3011_p3 }
  0x48   : > { %p3017_p12 = pnand %p3016_p8, %p3012_p5 }
  0x4a   : > { %3020 = shalt.err (!%p3017_p12)
}
  0x4b   : > { %s3021_s14 = scalar_lea.vmem %s3277_s20, 256  ;;  %s3115_s17 = smov [#allocation2]  }
  0x4c   : > { %p3022_p7 = scmp.ne.s32.totalorder %s3277_s20, %s3021_s14  ;;  %s3026_s19 = sshll.u32 %s3115_s17, 4  ;;  %s3027_s19 = int_to_ptr.vmem [resolvable:$false] %s3026_s19 }
  0x4d   : > { %s3028_s9 = scalar_lea.vmem %s3027_s19, 512  ;;  %p3029_p0 = scmp.lt.s32.totalorder %s3277_s20, %s3027_s19 }
  0x4e   : > { %p3024_p10 = pnand %p3022_p7, %p3010_p2  ;;  %p3030_p1 = scmp.lt.s32.totalorder %s3028_s9, %s3021_s14 }
  0x50   : > { %p3025_p13 = pneg %p3024_p10  ;;  %p3031_p3 = por %p3030_p1, %p3029_p0 }
  0x52   : > { %p3032_p9 = pnand %p3031_p3, %p3025_p13 }
  0x54   : > { %3035 = shalt.err (!%p3032_p9)
}
  0x55   : > { %s3116_s7 = smov 128   ;;  %s3117_s10 = smov 8  }
  0x56   : > { %2811 = dma.hbm_to_vmem [thread:$0]  (!%p3273_p11), %s3271_s18, 256, %s3277_s20, %s3279_s30, %s3116_s7, %s3116_s7, %s3117_s10  }
  0x57   : > { %p3772_p2 = scmp.ne.s32.totalorder %s3767_s29, 0 }
  0x58   : > { %s3303_s15 = sand.u32 (!%p3772_p2), 1, %s3100_s22   ;;  %p3773_p9 = scmp.ne.s32.totalorder (!%p3772_p2), %s3765_s27, 0 }
  0x59   : > { %265 = sbr.rel (%p3772_p2) target bundleno = 1707 (0x6ab), region = 44  ;;  %s2580_s12 = sshll.u32 (!%p3772_p2), %s3303_s15, 4 }
  0x5a   : > { %s268_s16 = scalar_lea.sflag (!%p3772_p2), [#allocation3], %s3303_s15  ;;  %s3309_s14 = scalar_lea.vmem (!%p3772_p2), [#allocation2], %s2580_s12 }
  0x5e   : > { %3079 = dma.done.wait (%p3773_p9), %s268_s16, 256  }
  0x5f   : > { %3081 = vsyncadd (%p3773_p9), %s268_s16, 4294967040  ;;  %p3774_p11 = scmp.eq.s32.totalorder %s3189_s25, 0 }
  0x61   : > { %3083 = dma.done.wait (%p3774_p11), [#allocation6], 384   ;;  %p3775_p5 = pmov %p3774_p11 }
  0x63   : > { %3085 = vsyncadd (%p3775_p5), [#allocation6], 4294966912  ;;  %p3776_p4 = pmov %p3775_p5 }
  0x65   : > { %3087 = dma.done.wait (%p3776_p4), [#allocation9], 256   ;;  %p3777_p6 = pmov %p3776_p4 }
  0x66   : > { %v3118_v0 = vmov 0.0   ;;  %vm3119_vm0 = vmmov 0   ;;  %v2892_v1 = vld [vmem:[#allocation7 + $0x8] sm:$0xff]   ;;  %v2893_v2 = vld [vmem:[#allocation7] sm:$0xff]   ;;  %vm341_vm1 = vcmask 261120   ;;  %s3120_s18 = smov 104   ;;  %v420_v19 = vlaneseq }
  0x67   : > { %3089 = vsyncadd (%p3777_p6), [#allocation9], 4294967040  ;;  %2670 = vmatprep.subr.bf16.mxu0 %v3118_v0  ;;  %2674 = vmatprep.mubr.msk.bf16.mxu0 %vm3119_vm0, %v3118_v0  ;;  %v315_v3 = vld [vmem:[%s3309_s14] sm:$0xff]  ;;  %v316_v4 = vld [vmem:[%s3309_s14 + $0x8] sm:$0xff]  ;;  %s3121_s20 = smov 120   ;;  %s3122_s26 = smov 96  }
  0x68   : > { %2678 = vmatprep.subr.bf16.mxu1 %v3118_v0  ;;  %2680 = vmatprep.mubr.msk.bf16.mxu1 %vm3119_vm0, %v3118_v0  ;;  %v317_v5 = vpack.c.bf16 %v316_v4, %v315_v3  ;;  %v2585_v7 = vld [vmem:[%s3757_s3] ss:$0 sm:$0xff]  ;;  %s3123_s30 = smov 112   ;;  %v3124_v17 = vmov 1983009808   ;;  %v421_v22 = vshrl.u32 %v420_v19, 7 }
  0x69   : > { %2671 = vmatpush3.bf16.msra.mxu0 %v2892_v1  ;;  %v418_v18 = vunpack.c.l.s4 %v3124_v17  ;;  %v3125_v25 = vmov 1934713408   ;;  %v3126_v41 = vmov 0   ;;  %vm1232_vm2 = vcmask 64512   ;;  %s3127_s17 = smov 64   ;;  %s3128_s19 = smov 16  }
  0x6a   : > { %2672 = vmatprep.subr.bf16.mxu0 %v3118_v0  ;;  %v449_v26 = vunpack.c.l.s4 %v3125_v25  ;;  %v3379_v42 = vpack.i.b16 %v3126_v41, %v3126_v41  ;;  %vm1712_vm4 = vcmask 1043456   ;;  %s3129_s9 = smov 8   ;;  %s3130_s7 = smov 24   ;;  %vm2376_vm5 = vcmask 130048  }
  0x6b   : > { %v419_v21 = vunpack.c.0.s8 %v418_v18  ;;  %vm2379_vm6 = vcmask 195584   ;;  %s2631_s27 = sshll.u32 %s3189_s25, 8  ;;  %s311_s29 = scalar_lea.vmem [#allocation10], %s2580_s12 }
  0x6c   : > { %v450_v33 = vunpack.c.0.s8 %v449_v26  ;;  %s2455_s25 = scalar_lea.sflag [#allocation4], %s3303_s15  ;;  %p3778_p12 = scmp.ne.s32.totalorder %s3770_s13, 0 }
  0x6d   : > { %2673 = vmatpush3.bf16.msra.mxu0 %v2893_v2  ;;  %v3362_v30 = vsub.s32 %v419_v21, %v421_v22 }
  0x6e   : > { %2684 = vmatprep.subr.bf16.mxu0 %v3118_v0  ;;  %v3381_v44 = vsub.s32 %v450_v33, %v421_v22 }
  0x70   : > { %2675 = vmatmul.mubr.msk.bf16.vlgmr.msra.gmra.mxu0 %vm341_vm1, %v317_v5 }
  0x71   : > { %2686 = vmatprep.mubr.msk.bf16.mxu0 %vm3119_vm0, %v3118_v0 }
 0x130   : > { %v379_v6 = vpop.f32.mrf.mxu0 }
 0x131   : > { %v380_v10 = vadd.f32 %v2585_v7, %v379_v6 }
 0x132   : > { %v2676_v8 = vpop.f32.mrf.mxu0 }
 0x134   : > { %v382_v9 = vpop.f32.mrf.mxu0 }
 0x135   : > { %v383_v11 = vadd.f32 %v2585_v7, %v382_v9 }
 0x136   : > { %v2677_v12 = vpop.f32.mrf.mxu0 }
 0x137   : > { %v3339_v13 = vpack.c.bf16 %v383_v11, %v380_v10 }
 0x139   : > { %392 = vrot.lane.b32.xlu1 %v3339_v13, %s3120_s18  ;;  %388 = vrot.lane.b32.xlu0 %v3339_v13, %s3121_s20  ;;  %v398_v28 = vshrl.u32 %v3339_v13, 16  ;;  %s2468_s18 = sshll.u32 %s311_s29, 4  ;;  %s3709_s18 = int_to_ptr.vmem [resolvable:$true] %s2468_s18 }
 0x13a   : > { %s3036_s12 = scalar_lea.vmem %s3709_s18, 256 }
 0x13b   : > { %p3037_p8 = scmp.ne.s32.totalorder %s3709_s18, %s3036_s12 }
 0x13d   : > { %672 = vrot.lane.b32.xlu1 %v3339_v13, %s3122_s26  ;;  %390 = vrot.lane.b32.xlu0 %v3339_v13, %s3123_s30  ;;  %s3706_s30 = scalar_lea.hbm %s3760_s6, %s2631_s27  ;;  %p3038_p7 = pnand %p3037_p8, %p3778_p12 }
 0x13f   : > { %p3039_p10 = pneg %p3038_p7 }
 0x1ab   : > { %v3345_v14 = vpop.permute.xlu0 %388  ;;  %v3348_v15 = vpop.permute.xlu1 %392 }
 0x1ac   : > { %674 = vrot.lane.b32.xlu0 %v3345_v14, %s3122_s26  ;;  %v407_v23 = vshrl.u32 %v3348_v15, 16  ;;  %v399_v24 = vshrl.u32 %v3345_v14, 16  ;;  %v3366_v31 = vpack.i.b16 %v3345_v14, %v3339_v13 }
 0x1ae   : > { %v3368_v32 = vpack.i.b16 %v399_v24, %v398_v28  ;;  %v423_v37 = vrot.slane %v3366_v31, %v3362_v30  ;;  %v416_v55 = vcombine.high %v3366_v31, %v3379_v42 }
 0x1af   : > { %v3350_v16 = vpop.permute.xlu0 %390  ;;  %v673_v35 = vpop.permute.xlu1 %672 }
 0x1b0   : > { %678 = vrot.lane.b32.xlu0 %v3348_v15, %s3122_s26  ;;  %676 = vrot.lane.b32.xlu1 %v3350_v16, %s3122_s26  ;;  %v406_v20 = vshrl.u32 %v3350_v16, 16  ;;  %v3359_v27 = vpack.i.b16 %v3348_v15, %v3350_v16  ;;  %v489_v39 = vrot.slane %v3368_v32, %v3362_v30  ;;  %v684_v43 = vshrl.u32 %v673_v35, 16 }
 0x1b1   : > { %v482_v4 = vcombine.high %v3368_v32, %v3379_v42 }
 0x1b2   : > { %v408_v29 = vpack.i.b16 %v407_v23, %v406_v20  ;;  %v438_v34 = vrot.slane %v3359_v27, %v3362_v30  ;;  %v431_v5 = vcombine.high %v3359_v27, %v3379_v42 }
 0x1b4   : > { %v504_v36 = vrot.slane %v408_v29, %v3362_v30  ;;  %v446_v45 = vcombine.low %v423_v37, %v438_v34  ;;  %v447_v46 = vcombine.high %v423_v37, %v438_v34  ;;  %v497_v52 = vcombine.high %v408_v29, %v3379_v42 }
 0x1b6   : > { %v512_v47 = vcombine.low %v489_v39, %v504_v36  ;;  %v513_v48 = vcombine.high %v489_v39, %v504_v36  ;;  %v454_v56 = vrot.slane %v446_v45, %v3381_v44  ;;  %v461_v59 = vrot.slane %v447_v46, %v3381_v44 }
 0x1b7   : > { %v3399_v6 = vrot.slane %v497_v52, %v3362_v30  ;;  %v496_v52 = vrot.slane %v482_v4, %v3362_v30 }
 0x1b8   : > { %v520_v60 = vrot.slane %v512_v47, %v3381_v44  ;;  %v527_v61 = vrot.slane %v513_v48, %v3381_v44  ;;  %v548_v12 = vcombine.low %v454_v56, %v461_v59  ;;  %v2589_v37 = vcombine.high %v454_v56, %v461_v59 }
 0x1ba   : > { %v573_v17 = vcombine.low %v520_v60, %v527_v61  ;;  %v2590_v20 = vcombine.high %v520_v60, %v527_v61  ;;  %v430_v61 = vrot.slane %v416_v55, %v3362_v30 }
 0x21e   : > { %v675_v38 = vpop.permute.xlu0 %674 }
 0x21f   : > { %v685_v40 = vshrl.u32 %v675_v38, 16  ;;  %v682_v49 = vpack.i.b16 %v675_v38, %v673_v35 }
 0x221   : > { %v686_v53 = vpack.i.b16 %v685_v40, %v684_v43  ;;  %v696_v62 = vcombine.high %v682_v49, %v3379_v42  ;;  %v703_v63 = vrot.slane %v682_v49, %v3362_v30  ;;  %v580_v40 = vrot.slane %v573_v17, %v3362_v30 }
 0x222   : > { %v677_v50 = vpop.permute.xlu1 %676  ;;  %v679_v51 = vpop.permute.xlu0 %678 }
 0x223   : > { %v692_v54 = vshrl.u32 %v677_v50, 16  ;;  %v690_v57 = vpack.i.b16 %v679_v51, %v677_v50  ;;  %v693_v58 = vshrl.u32 %v679_v51, 16  ;;  %v762_v7 = vcombine.high %v686_v53, %v3379_v42 }
 0x224   : > { %v769_v18 = vrot.slane %v686_v53, %v3362_v30  ;;  %v710_v21 = vrot.slane %v696_v62, %v3362_v30  ;;  %v588_v51 = vrot.slane %v2590_v20, %v3362_v30  ;;  %v445_v53 = vrot.slane %v431_v5, %v3362_v30 }
 0x225   : > { %v694_v1 = vpack.i.b16 %v693_v58, %v692_v54  ;;  %v711_v2 = vcombine.high %v690_v57, %v3379_v42  ;;  %v718_v3 = vrot.slane %v690_v57, %v3362_v30  ;;  %v776_v24 = vrot.slane %v762_v7, %v3362_v30 }
 0x226   : > { %v555_v57 = vrot.slane %v548_v12, %v3362_v30  ;;  %v563_v58 = vrot.slane %v2589_v37, %v3362_v30  ;;  %v589_v4 = vcombine.low %v580_v40, %v588_v51  ;;  %v462_v5 = vcombine.low %v430_v61, %v445_v53 }
 0x227   : > { %v725_v8 = vrot.slane %v711_v2, %v3362_v30  ;;  %v726_v9 = vcombine.low %v703_v63, %v718_v3  ;;  %v727_v10 = vcombine.high %v703_v63, %v718_v3  ;;  %v777_v11 = vcombine.high %v694_v1, %v3379_v42 }
 0x228   : > { %v784_v19 = vrot.slane %v694_v1, %v3362_v30  ;;  %v528_v1 = vcombine.low %v496_v52, %v3399_v6  ;;  %v529_v2 = vcombine.high %v496_v52, %v3399_v6  ;;  %v463_v7 = vcombine.high %v430_v61, %v445_v53 }
 0x229   : > { %v734_v22 = vrot.slane %v726_v9, %v3381_v44  ;;  %v741_v23 = vrot.slane %v727_v10, %v3381_v44  ;;  %v791_v25 = vrot.slane %v777_v11, %v3362_v30  ;;  %v742_v28 = vcombine.low %v710_v21, %v725_v8 }
 0x22a   : > { %v792_v26 = vcombine.low %v769_v18, %v784_v19  ;;  %v793_v27 = vcombine.high %v769_v18, %v784_v19  ;;  %v743_v29 = vcombine.high %v710_v21, %v725_v8  ;;  %v564_v10 = vcombine.low %v555_v57, %v563_v58 }
 0x22b   : > { %v828_v31 = vcombine.low %v734_v22, %v741_v23  ;;  %v2593_v32 = vcombine.high %v734_v22, %v741_v23  ;;  %v808_v35 = vcombine.low %v776_v24, %v791_v25  ;;  %v809_v36 = vcombine.high %v776_v24, %v791_v25 }
 0x22c   : > { %v800_v33 = vrot.slane %v792_v26, %v3381_v44  ;;  %v807_v34 = vrot.slane %v793_v27, %v3381_v44  ;;  %v750_v48 = vrot.slane %v742_v28, %v3381_v44  ;;  %v757_v49 = vrot.slane %v743_v29, %v3381_v44 }
 0x22d   : > { %v835_v38 = vrot.slane %v828_v31, %v3362_v30  ;;  %v843_v39 = vrot.slane %v2593_v32, %v3362_v30  ;;  %v816_v43 = vrot.slane %v808_v35, %v3381_v44  ;;  %v823_v45 = vrot.slane %v809_v36, %v3381_v44 }
 0x22e   : > { %v853_v46 = vcombine.low %v800_v33, %v807_v34  ;;  %v2594_v47 = vcombine.high %v800_v33, %v807_v34  ;;  %v878_v3 = vcombine.low %v750_v48, %v757_v49  ;;  %v2595_v8 = vcombine.high %v750_v48, %v757_v49 }
 0x22f   : > { %v844_v50 = vcombine.low %v835_v38, %v843_v39  ;;  %v903_v59 = vcombine.low %v816_v43, %v823_v45  ;;  %v2596_v60 = vcombine.high %v816_v43, %v823_v45  ;;  %v536_v6 = vrot.slane %v528_v1, %v3381_v44 }
 0x230   : > { %v860_v54 = vrot.slane %v853_v46, %v3362_v30  ;;  %v868_v56 = vrot.slane %v2594_v47, %v3362_v30  ;;  %v543_v20 = vrot.slane %v529_v2, %v3381_v44  ;;  %v885_v21 = vrot.slane %v878_v3, %v3362_v30 }
 0x231   : > { %v851_v62 = vrot.slane %v844_v50, %v3381_v44  ;;  %v910_v11 = vrot.slane %v903_v59, %v3362_v30  ;;  %v918_v55 = vrot.slane %v2596_v60, %v3362_v30  ;;  %v596_v22 = vrot.slane %v589_v4, %v3381_v44 }
 0x232   : > { %v869_v63 = vcombine.low %v860_v54, %v868_v56  ;;  %v893_v23 = vrot.slane %v2595_v8, %v3362_v30  ;;  %v470_v27 = vrot.slane %v462_v5, %v3381_v44  ;;  %v477_v28 = vrot.slane %v463_v7, %v3381_v44 }
 0x233   : > { %v931_v17 = vshrl.u32 %v851_v62, 16  ;;  %v852_v26 = vcombine.high %v851_v62, %v3126_v41  ;;  %v571_v31 = vrot.slane %v564_v10, %v3381_v44  ;;  %v919_v33 = vcombine.low %v910_v11, %v918_v55 }
 0x234   : > { %v876_v9 = vrot.slane %v869_v63, %v3381_v44  ;;  %v623_v34 = vcombine.low %v536_v6, %v543_v20  ;;  %v2592_v35 = vcombine.high %v536_v6, %v543_v20  ;;  %v652_v37 = vshrl.u32 %v596_v22, 16 }
 0x235   : > { %v937_v38 = vshrl.u32 %v852_v26, 16  ;;  %v894_v39 = vcombine.low %v885_v21, %v893_v23  ;;  %v598_v40 = vcombine.low %v470_v27, %v477_v28  ;;  %v2591_v43 = vcombine.high %v470_v27, %v477_v28 }
 0x236   : > { %v930_v12 = vpack.i.b16 %v876_v9, %v851_v62  ;;  %v932_v18 = vshrl.u32 %v876_v9, 16  ;;  %v877_v19 = vcombine.high %v876_v9, %v3126_v41  ;;  %v650_v45 = vpack.i.b16 %v596_v22, %v571_v31 }
 0x237   : > { %v651_v46 = vshrl.u32 %v571_v31, 16  ;;  %v926_v48 = vrot.slane %v919_v33, %v3381_v44  ;;  %v630_v49 = vrot.slane %v623_v34, %v3362_v30  ;;  %v638_v50 = vrot.slane %v2592_v35, %v3362_v30  ;;  %v1601_v33 = vld [vmem:[#allocation5] sm:$0xff] }
 0x238   : > { %v1237_v24 = vsel %vm1232_vm2, %v930_v12, 0  ;;  %v933_v25 = vpack.i.b16 %v932_v18, %v931_v17  ;;  %v938_v32 = vshrl.u32 %v877_v19, 16  ;;  %v936_v36 = vpack.i.b16 %v877_v19, %v852_v26 }
 0x239   : > { %2679 = vmatpush3.bf16.xpose.msra.mxu1 %v1237_v24  ;;  %v653_v52 = vpack.i.b16 %v652_v37, %v651_v46  ;;  %v597_v53 = vcombine.high %v596_v22, %v3126_v41  ;;  %v901_v54 = vrot.slane %v894_v39, %v3381_v44  ;;  %v605_v56 = vrot.slane %v598_v40, %v3362_v30 }
 0x23a   : > { %v1283_v29 = vsel %vm1232_vm2, %v933_v25, 0  ;;  %2690 = vmatprep.subr.bf16.mxu1 %v3118_v0  ;;  %v939_v47 = vpack.i.b16 %v938_v32, %v937_v38  ;;  %v1329_v51 = vsel %vm1232_vm2, %v936_v36, 0  ;;  %v613_v57 = vrot.slane %v2591_v43, %v3362_v30 }
 0x23b   : > { %2685 = vmatpush3.bf16.xpose.msra.mxu0 %v1283_v29  ;;  %v572_v59 = vcombine.high %v571_v31, %v3126_v41  ;;  %v944_v60 = vshrl.u32 %v926_v48, 16  ;;  %v942_v61 = vpack.i.b16 %v926_v48, %v901_v54  ;;  %v658_v62 = vshrl.u32 %v597_v53, 16 }
 0x23c   : > { %2696 = vmatprep.subr.bf16.mxu0 %v3118_v0  ;;  %v1375_v58 = vsel %vm1232_vm2, %v939_v47, 0  ;;  %v943_v63 = vshrl.u32 %v901_v54, 16  ;;  %v639_v1 = vcombine.low %v630_v49, %v638_v50  ;;  %v614_v2 = vcombine.low %v605_v56, %v613_v57 }
 0x23d   : > { %v656_v3 = vpack.i.b16 %v597_v53, %v572_v59  ;;  %v657_v4 = vshrl.u32 %v572_v59, 16  ;;  %v927_v7 = vcombine.high %v926_v48, %v3126_v41  ;;  %v1421_v8 = vsel %vm1232_vm2, %v942_v61, 0 }
 0x23e   : > { %v945_v5 = vpack.i.b16 %v944_v60, %v943_v63  ;;  %v646_v10 = vrot.slane %v639_v1, %v3381_v44  ;;  %v902_v11 = vcombine.high %v901_v54, %v3126_v41  ;;  %v621_v12 = vrot.slane %v614_v2, %v3381_v44 }
 0x23f   : > { %v659_v9 = vpack.i.b16 %v658_v62, %v657_v4  ;;  %v950_v17 = vshrl.u32 %v927_v7, 16  ;;  %vm1602_vm3 = vcmp.gt.f32.partialorder %v1601_v33, 0.5 }
 0x240   : > { %2681 = vmatmul.mubr.msk.bf16.vlgmr.msra.gmra.mxu1 %vm1232_vm2, %v650_v45  ;;  %v1467_v55 = vsel %vm1232_vm2, %v945_v5, 0  ;;  %v948_v18 = vpack.i.b16 %v927_v7, %v902_v11  ;;  %v664_v19 = vshrl.u32 %v646_v10, 16  ;;  %v949_v6 = vshrl.u32 %v902_v11, 16 }
 0x241   : > { %2691 = vmatpush3.bf16.xpose.msra.mxu1 %v1329_v51  ;;  %2692 = vmatprep.mubr.msk.bf16.mxu1 %vm3119_vm0, %v3118_v0  ;;  %v662_v20 = vpack.i.b16 %v646_v10, %v621_v12  ;;  %v663_v21 = vshrl.u32 %v621_v12, 16  ;;  %v647_v25 = vcombine.high %v646_v10, %v3126_v41  ;;  %v622_v27 = vcombine.high %v621_v12, %v3126_v41 }
 0x242   : > { %2687 = vmatmul.mubr.msk.bf16.vlgmr.msra.gmra.mxu0 %vm1232_vm2, %v653_v52  ;;  %2702 = vmatprep.subr.bf16.mxu1 %v3118_v0  ;;  %v951_v22 = vpack.i.b16 %v950_v17, %v949_v6  ;;  %v1513_v23 = vsel %vm1232_vm2, %v948_v18, 0 }
 0x243   : > { %2697 = vmatpush3.bf16.xpose.msra.mxu0 %v1375_v58  ;;  %2698 = vmatprep.mubr.msk.bf16.mxu0 %vm3119_vm0, %v3118_v0  ;;  %v665_v24 = vpack.i.b16 %v664_v19, %v663_v21  ;;  %v670_v28 = vshrl.u32 %v647_v25, 16  ;;  %v668_v29 = vpack.i.b16 %v647_v25, %v622_v27  ;;  %v669_v31 = vshrl.u32 %v622_v27, 16 }
 0x244   : > { %2708 = vmatprep.subr.bf16.mxu0 %v3118_v0  ;;  %v1559_v26 = vsel %vm1232_vm2, %v951_v22, 0 }
 0x245   : > { %v671_v32 = vpack.i.b16 %v670_v28, %v669_v31 }
 0x248   : > { %2693 = vmatmul.mubr.msk.bf16.vlgmr.msra.gmra.mxu1 %vm1232_vm2, %v656_v3 }
 0x249   : > { %2703 = vmatpush3.bf16.xpose.msra.mxu1 %v1421_v8  ;;  %2704 = vmatprep.mubr.msk.bf16.mxu1 %vm3119_vm0, %v3118_v0 }
 0x24a   : > { %2699 = vmatmul.mubr.msk.bf16.vlgmr.msra.gmra.mxu0 %vm1232_vm2, %v659_v9  ;;  %2714 = vmatprep.subr.bf16.mxu1 %v3118_v0 }
 0x24b   : > { %2709 = vmatpush3.bf16.xpose.msra.mxu0 %v1467_v55  ;;  %2710 = vmatprep.mubr.msk.bf16.mxu0 %vm3119_vm0, %v3118_v0 }
 0x24c   : > { %2720 = vmatprep.subr.bf16.mxu0 %v3118_v0 }
 0x250   : > { %2705 = vmatmul.mubr.msk.bf16.vlgmr.msra.gmra.mxu1 %vm1232_vm2, %v662_v20 }
 0x251   : > { %2715 = vmatpush3.bf16.xpose.msra.mxu1 %v1513_v23  ;;  %2716 = vmatprep.mubr.msk.bf16.mxu1 %vm3119_vm0, %v3118_v0 }
 0x252   : > { %2711 = vmatmul.mubr.msk.bf16.vlgmr.msra.gmra.mxu0 %vm1232_vm2, %v665_v24  ;;  %2726 = vmatprep.subr.bf16.mxu1 %v3118_v0 }
 0x253   : > { %2721 = vmatpush3.bf16.xpose.msra.mxu0 %v1559_v26  ;;  %2722 = vmatprep.mubr.msk.bf16.mxu0 %vm3119_vm0, %v3118_v0 }
 0x254   : > { %2732 = vmatprep.subr.bf16.mxu0 %v3118_v0 }
 0x258   : > { %2717 = vmatmul.mubr.msk.bf16.vlgmr.msra.gmra.mxu1 %vm1232_vm2, %v668_v29 }
 0x259   : > { %2728 = vmatprep.mubr.msk.bf16.mxu1 %vm3119_vm0, %v3118_v0 }
 0x25a   : > { %2723 = vmatmul.mubr.msk.bf16.vlgmr.msra.gmra.mxu0 %vm1232_vm2, %v671_v32 }
 0x25b   : > { %2734 = vmatprep.mubr.msk.bf16.mxu0 %vm3119_vm0, %v3118_v0 }
 0x300   : > { %v1273_v34 = vpop.f32.mrf.mxu1 }
 0x301   : > { %v1605_v35 = vsel %vm1602_vm3, -10000.0, %v1273_v34 }
 0x302   : > { %v2682_v36 = vpop.f32.mrf.mxu1  ;;  %v1319_v37 = vpop.f32.mrf.mxu0  ;;  %v1613_v38 = vsel %vm1232_vm2, %v1605_v35, -inf }
 0x303   : > { %v1606_v39 = vsel %vm1602_vm3, -10000.0, %v1319_v37  ;;  %1614 = vmax.xlane.f32.xlu1 %v1613_v38 }
 0x304   : > { %v1276_v40 = vpop.f32.mrf.mxu1  ;;  %v2688_v43 = vpop.f32.mrf.mxu0  ;;  %v1616_v45 = vsel %vm1232_vm2, %v1606_v39, -inf }
 0x305   : > { %1617 = vmax.xlane.f32.xlu0 %v1616_v45 }
 0x306   : > { %v2683_v46 = vpop.f32.mrf.mxu1  ;;  %v1322_v47 = vpop.f32.mrf.mxu0 }
 0x308   : > { %v2689_v48 = vpop.f32.mrf.mxu0  ;;  %v1365_v49 = vpop.f32.mrf.mxu1 }
 0x309   : > { %v3503_v50 = vsel %vm1602_vm3, -10000.0, %v1365_v49 }
 0x30a   : > { %v2694_v51 = vpop.f32.mrf.mxu1  ;;  %v1411_v52 = vpop.f32.mrf.mxu0  ;;  %v1619_v53 = vsel %vm1232_vm2, %v3503_v50, -inf }
 0x30b   : > { %v1608_v54 = vsel %vm1602_vm3, -10000.0, %v1411_v52  ;;  %1620 = vmax.xlane.f32.xlu0 %v1619_v53 }
 0x30c   : > { %v1368_v56 = vpop.f32.mrf.mxu1  ;;  %v2700_v57 = vpop.f32.mrf.mxu0  ;;  %v1622_v58 = vsel %vm1232_vm2, %v1608_v54, -inf }
 0x30d   : > { %1623 = vmax.xlane.f32.xlu1 %v1622_v58 }
 0x30e   : > { %v2695_v59 = vpop.f32.mrf.mxu1  ;;  %v1414_v60 = vpop.f32.mrf.mxu0 }
 0x310   : > { %v2701_v61 = vpop.f32.mrf.mxu0  ;;  %v1457_v62 = vpop.f32.mrf.mxu1 }
 0x311   : > { %v1609_v63 = vsel %vm1602_vm3, -10000.0, %v1457_v62 }
 0x312   : > { %v2706_v1 = vpop.f32.mrf.mxu1  ;;  %v1503_v2 = vpop.f32.mrf.mxu0  ;;  %v1625_v3 = vsel %vm1232_vm2, %v1609_v63, -inf }
 0x313   : > { %v1610_v4 = vsel %vm1602_vm3, -10000.0, %v1503_v2  ;;  %1626 = vmax.xlane.f32.xlu0 %v1625_v3 }
 0x314   : > { %v1460_v5 = vpop.f32.mrf.mxu1  ;;  %v2712_v7 = vpop.f32.mrf.mxu0  ;;  %v1628_v8 = vsel %vm1232_vm2, %v1610_v4, -inf }
 0x315   : > { %1629 = vmax.xlane.f32.xlu1 %v1628_v8 }
 0x316   : > { %v2707_v9 = vpop.f32.mrf.mxu1  ;;  %v1506_v10 = vpop.f32.mrf.mxu0 }
 0x318   : > { %v2713_v11 = vpop.f32.mrf.mxu0  ;;  %v1549_v55 = vpop.f32.mrf.mxu1 }
 0x319   : > { %v1611_v12 = vsel %vm1602_vm3, -10000.0, %v1549_v55 }
 0x31a   : > { %v2718_v17 = vpop.f32.mrf.mxu1  ;;  %v1595_v18 = vpop.f32.mrf.mxu0  ;;  %v1631_v19 = vsel %vm1232_vm2, %v1611_v12, -inf }
 0x31b   : > { %v1612_v6 = vsel %vm1602_vm3, -10000.0, %v1595_v18  ;;  %1632 = vmax.xlane.f32.xlu0 %v1631_v19 }
 0x31c   : > { %v1552_v20 = vpop.f32.mrf.mxu1  ;;  %v2724_v21 = vpop.f32.mrf.mxu0  ;;  %v1634_v22 = vsel %vm1232_vm2, %v1612_v6, -inf }
 0x31d   : > { %1635 = vmax.xlane.f32.xlu1 %v1634_v22 }
 0x31e   : > { %v2719_v23 = vpop.f32.mrf.mxu1  ;;  %v1598_v24 = vpop.f32.mrf.mxu0 }
 0x320   : > { %v2725_v25 = vpop.f32.mrf.mxu0 }
 0x32e   : > { %954 = vrot.lane.b32.xlu1 %v3345_v14, %s3127_s17 }
 0x331   : > { %952 = vrot.lane.b32.xlu0 %v3339_v13, %s3127_s17 }
 0x38c   : > { %v1615_v26 = vpop.xlane.xlu1 %1614 }
 0x38d   : > { %v1637_v27 = vsub.f32 %v1605_v35, %v1615_v26 }
 0x38e   : > { %v1618_v28 = vpop.xlane.xlu0 %1617 }
 0x38f   : > { %v1645_v29 = vmul.f32 1.442695, %v1637_v27  ;;  %v1638_v31 = vsub.f32 %v1606_v39, %v1618_v28 }
 0x391   : > { %2896 = vpow2.f32 %v1645_v29  ;;  %v1647_v32 = vmul.f32 1.442695, %v1638_v31 }
 0x393   : > { %2898 = vpow2.f32 %v1647_v32 }
 0x394   : > { %v1621_v13 = vpop.xlane.xlu0 %1620 }
 0x395   : > { %v1639_v39 = vsub.f32 %v3503_v50, %v1621_v13 }
 0x396   : > { %v1624_v35 = vpop.xlane.xlu1 %1623 }
 0x397   : > { %v1640_v37 = vsub.f32 %v1608_v54, %v1624_v35  ;;  %v1649_v47 = vmul.f32 1.442695, %v1639_v39 }
 0x399   : > { %v1651_v43 = vmul.f32 1.442695, %v1640_v37 }
 0x39b   : > { %2900 = vpow2.f32 %v1651_v43 }
 0x39c   : > { %v1627_v38 = vpop.xlane.xlu0 %1626  ;;  %2902 = vpow2.f32 %v1649_v47 }
 0x39d   : > { %v1641_v45 = vsub.f32 %v1609_v63, %v1627_v38 }
 0x39e   : > { %v3519_v33 = vpop.eup %2896  ;;  %v1630_v40 = vpop.xlane.xlu1 %1629 }
 0x39f   : > { %v1661_v34 = vsel %vm1232_vm2, %v3519_v33, 0.0  ;;  %v1642_v48 = vsub.f32 %v1610_v4, %v1630_v40  ;;  %v1653_v51 = vmul.f32 1.442695, %v1641_v45 }
 0x3a0   : > { %v3523_v36 = vpop.eup %2898  ;;  %1662 = vadd.xlane.f32.xlu0 %v1661_v34 }
 0x3a1   : > { %v1664_v14 = vsel %vm1232_vm2, %v3523_v36, 0.0  ;;  %2904 = vpow2.f32 %v1653_v51 }
 0x3a2   : > { %1665 = vadd.xlane.f32.xlu1 %v1664_v14 }
 0x3a4   : > { %v1633_v46 = vpop.xlane.xlu0 %1632 }
 0x3a5   : > { %v1643_v52 = vsub.f32 %v1611_v12, %v1633_v46 }
 0x3a6   : > { %v1636_v49 = vpop.xlane.xlu1 %1635 }
 0x3a7   : > { %v1644_v53 = vsub.f32 %v1612_v6, %v1636_v49 }
 0x3a8   : > { %v3530_v50 = vpop.eup %2900  ;;  %v953_v4 = vpop.permute.xlu0 %952 }
 0x3a9   : > { %v1659_v54 = vmul.f32 1.442695, %v1644_v53  ;;  %v3532_v56 = vpop.eup %2902  ;;  %v1670_v57 = vsel %vm1232_vm2, %v3530_v50, 0.0  ;;  %v964_v55 = vshrl.u32 %v953_v4, 16 }
 0x3aa   : > { %v1667_v59 = vsel %vm1232_vm2, %v3532_v56, 0.0  ;;  %v955_v5 = vpop.permute.xlu1 %954 }
 0x3ab   : > { %v965_v9 = vshrl.u32 %v955_v5, 16  ;;  %v3554_v11 = vpack.i.b16 %v955_v5, %v953_v4 }
 0x3ad   : > { %v3558_v6 = vpack.i.b16 %v965_v9, %v964_v55  ;;  %v983_v20 = vrot.slane %v3554_v11, %v3362_v30 }
 0x3ae   : > { %v3536_v58 = vpop.eup %2904 }
 0x3af   : > { %v1673_v61 = vsel %vm1232_vm2, %v3536_v58, 0.0  ;;  %v1049_v25 = vrot.slane %v3558_v6, %v3362_v30 }
 0x3b3   : > { %956 = vrot.lane.b32.xlu1 %v3350_v16, %s3127_s17  ;;  %v1655_v16 = vmul.f32 1.442695, %v1642_v48 }
 0x3b5   : > { %2906 = vpow2.f32 %v1655_v16 }
 0x3b6   : > { %958 = vrot.lane.b32.xlu0 %v3348_v15, %s3127_s17  ;;  %v1657_v15 = vmul.f32 1.442695, %v1643_v52  ;;  %s3131_s17 = smov [#allocation10]  }
 0x3b8   : > { %2908 = vpow2.f32 %v1657_v15 }
 0x3b9   : > { %2910 = vpow2.f32 %v1659_v54 }
 0x3c2   : > { %v3540_v60 = vpop.eup %2906 }
 0x3c3   : > { %v1676_v63 = vsel %vm1232_vm2, %v3540_v60, 0.0 }
 0x3c5   : > { %v3544_v62 = vpop.eup %2908 }
 0x3c6   : > { %v3548_v1 = vpop.eup %2910  ;;  %v1679_v2 = vsel %vm1232_vm2, %v3544_v62, 0.0 }
 0x3c7   : > { %v1682_v3 = vsel %vm1232_vm2, %v3548_v1, 0.0 }
 0x3d5   : > { %1671 = vadd.xlane.f32.xlu0 %v1670_v57 }
 0x3d7   : > { %1668 = vadd.xlane.f32.xlu1 %v1667_v59 }
 0x3d9   : > { %1674 = vadd.xlane.f32.xlu0 %v1673_v61 }
 0x3db   : > { %1677 = vadd.xlane.f32.xlu1 %v1676_v63 }
 0x3dd   : > { %1680 = vadd.xlane.f32.xlu0 %v1679_v2 }
 0x3df   : > { %1683 = vadd.xlane.f32.xlu1 %v1682_v3 }
 0x429   : > { %v1663_v7 = vpop.xlane.xlu0 %1662 }
 0x42a   : > { %2912 = vrcp.f32 %v1663_v7 }
 0x42b   : > { %v1666_v8 = vpop.xlane.xlu1 %1665 }
 0x42c   : > { %2914 = vrcp.f32 %v1666_v8 }
 0x42d   : > { %v959_v10 = vpop.permute.xlu0 %958 }
 0x42e   : > { %v973_v17 = vshrl.u32 %v959_v10, 16 }
 0x42f   : > { %v957_v12 = vpop.permute.xlu1 %956 }
 0x430   : > { %v3556_v18 = vpack.i.b16 %v959_v10, %v957_v12  ;;  %v972_v19 = vshrl.u32 %v957_v12, 16  ;;  %v1042_v10 = vcombine.high %v3558_v6, %v3379_v42 }
 0x432   : > { %v974_v21 = vpack.i.b16 %v973_v17, %v972_v19  ;;  %v998_v22 = vrot.slane %v3556_v18, %v3362_v30  ;;  %v991_v55 = vcombine.high %v3556_v18, %v3379_v42  ;;  %v976_v17 = vcombine.high %v3554_v11, %v3379_v42 }
 0x433   : > { %v1056_v6 = vrot.slane %v1042_v10, %v3362_v30 }
 0x434   : > { %v1006_v23 = vcombine.low %v983_v20, %v998_v22  ;;  %v1007_v24 = vcombine.high %v983_v20, %v998_v22  ;;  %v1064_v26 = vrot.slane %v974_v21, %v3362_v30  ;;  %v1057_v8 = vcombine.high %v974_v21, %v3379_v42 }
 0x435   : > { %v1005_v18 = vrot.slane %v991_v55, %v3362_v30  ;;  %v990_v20 = vrot.slane %v976_v17, %v3362_v30 }
 0x436   : > { %v1014_v27 = vrot.slane %v1006_v23, %v3381_v44  ;;  %v1021_v28 = vrot.slane %v1007_v24, %v3381_v44  ;;  %v1072_v29 = vcombine.low %v1049_v25, %v1064_v26  ;;  %v1073_v31 = vcombine.high %v1049_v25, %v1064_v26 }
 0x437   : > { %v2913_v47 = vpop.eup %2912  ;;  %v1071_v19 = vrot.slane %v1057_v8, %v3362_v30  ;;  %v1022_v23 = vcombine.low %v990_v20, %v1005_v18  ;;  %v1023_v24 = vcombine.high %v990_v20, %v1005_v18 }
 0x438   : > { %v1108_v32 = vcombine.low %v1014_v27, %v1021_v28  ;;  %v2597_v34 = vcombine.high %v1014_v27, %v1021_v28  ;;  %v1080_v14 = vrot.slane %v1072_v29, %v3381_v44  ;;  %v1087_v13 = vrot.slane %v1073_v31, %v3381_v44 }
 0x439   : > { %v2915_v51 = vpop.eup %2914  ;;  %v1693_v16 = vmul.f32 %v2913_v47, %v3519_v33  ;;  %v1088_v21 = vcombine.low %v1056_v6, %v1071_v19  ;;  %v1089_v22 = vcombine.high %v1056_v6, %v1071_v19  ;;  %v1030_v42 = vrot.slane %v1022_v23, %v3381_v44 }
 0x43a   : > { %v1115_v35 = vrot.slane %v1108_v32, %v3362_v30  ;;  %v1123_v37 = vrot.slane %v2597_v34, %v3362_v30  ;;  %v1133_v38 = vcombine.low %v1080_v14, %v1087_v13  ;;  %v2598_v39 = vcombine.high %v1080_v14, %v1087_v13 }
 0x43b   : > { %v1694_v59 = vmul.f32 %v2915_v51, %v3523_v36  ;;  %v1701_v7 = vpack.c.bf16 %v1693_v16, %v1693_v16  ;;  %v1096_v25 = vrot.slane %v1088_v21, %v3381_v44  ;;  %v1103_v26 = vrot.slane %v1089_v22, %v3381_v44 }
 0x43c   : > { %v1124_v40 = vcombine.low %v1115_v35, %v1123_v37  ;;  %v1140_v43 = vrot.slane %v1133_v38, %v3362_v30  ;;  %v1148_v45 = vrot.slane %v2598_v39, %v3362_v30  ;;  %v1037_v11 = vrot.slane %v1023_v24, %v3381_v44 }
 0x43d   : > { %v1702_v9 = vpack.c.bf16 %v1694_v59, %v1694_v59  ;;  %v1183_v27 = vcombine.low %v1096_v25, %v1103_v26  ;;  %v2600_v28 = vcombine.high %v1096_v25, %v1103_v26 }
 0x43e   : > { %v1131_v46 = vrot.slane %v1124_v40, %v3381_v44  ;;  %v1149_v48 = vcombine.low %v1140_v43, %v1148_v45  ;;  %v1158_v29 = vcombine.low %v1030_v42, %v1037_v11  ;;  %v2599_v31 = vcombine.high %v1030_v42, %v1037_v11 }
 0x43f   : > { %v1190_v32 = vrot.slane %v1183_v27, %v3362_v30  ;;  %v1198_v34 = vrot.slane %v2600_v28, %v3362_v30 }
 0x440   : > { %v1132_v49 = vcombine.high %v1131_v46, %v3126_v41  ;;  %v1156_v52 = vrot.slane %v1149_v48, %v3381_v44  ;;  %v1211_v15 = vshrl.u32 %v1131_v46, 16  ;;  %v1165_v13 = vrot.slane %v1158_v29, %v3362_v30 }
 0x441   : > { %v1173_v35 = vrot.slane %v2599_v31, %v3362_v30  ;;  %v1199_v38 = vcombine.low %v1190_v32, %v1198_v34 }
 0x442   : > { %v1210_v53 = vpack.i.b16 %v1156_v52, %v1131_v46  ;;  %v1212_v54 = vshrl.u32 %v1156_v52, 16  ;;  %v1157_v57 = vcombine.high %v1156_v52, %v3126_v41  ;;  %v1217_v61 = vshrl.u32 %v1132_v49, 16 }
 0x443   : > { %v1174_v40 = vcombine.low %v1165_v13, %v1173_v35  ;;  %v1206_v45 = vrot.slane %v1199_v38, %v3381_v44 }
 0x444   : > { %v1714_v63 = vsel %vm1712_vm4, %v1210_v53, 0  ;;  %v1213_v2 = vpack.i.b16 %v1212_v54, %v1211_v15  ;;  %v1216_v3 = vpack.i.b16 %v1157_v57, %v1132_v49  ;;  %v1218_v4 = vshrl.u32 %v1157_v57, 16 }
 0x445   : > { %2727 = vmatpush3.bf16.msra.mxu1 %v1714_v63  ;;  %v1181_v46 = vrot.slane %v1174_v40, %v3381_v44  ;;  %v1224_v48 = vshrl.u32 %v1206_v45, 16  ;;  %v1207_v15 = vcombine.high %v1206_v45, %v3126_v41 }
 0x446   : > { %v1760_v5 = vsel %vm1712_vm4, %v1213_v2, 0  ;;  %2738 = vmatprep.subr.bf16.mxu1 %v3118_v0  ;;  %v1219_v33 = vpack.i.b16 %v1218_v4, %v1217_v61  ;;  %v1806_v36 = vsel %vm1712_vm4, %v1216_v3, 0 }
 0x447   : > { %2733 = vmatpush3.bf16.msra.mxu0 %v1760_v5  ;;  %v1223_v51 = vshrl.u32 %v1181_v46, 16  ;;  %v1222_v61 = vpack.i.b16 %v1206_v45, %v1181_v46  ;;  %v1182_v63 = vcombine.high %v1181_v46, %v3126_v41  ;;  %v1230_v5 = vshrl.u32 %v1207_v15, 16 }
 0x448   : > { %2729 = vmatmul.mubr.msk.bf16.vlgmr.msra.gmra.mxu1 %vm1232_vm2, %v1701_v7  ;;  %2744 = vmatprep.subr.bf16.mxu0 %v3118_v0  ;;  %v1852_v12 = vsel %vm1712_vm4, %v1219_v33, 0 }
 0x449   : > { %2739 = vmatpush3.bf16.msra.mxu1 %v1806_v36  ;;  %2740 = vmatprep.mubr.msk.bf16.mxu1 %vm3119_vm0, %v3118_v0  ;;  %v1225_v53 = vpack.i.b16 %v1224_v48, %v1223_v51 }
 0x44a   : > { %2735 = vmatmul.mubr.msk.bf16.vlgmr.msra.gmra.mxu0 %vm1232_vm2, %v1702_v9  ;;  %2750 = vmatprep.subr.bf16.mxu1 %v3118_v0  ;;  %v1228_v9 = vpack.i.b16 %v1207_v15, %v1182_v63 }
 0x44b   : > { %2745 = vmatpush3.bf16.msra.mxu0 %v1852_v12  ;;  %2746 = vmatprep.mubr.msk.bf16.mxu0 %vm3119_vm0, %v3118_v0  ;;  %v1944_v3 = vsel %vm1712_vm4, %v1225_v53, 0 }
 0x44c   : > { %2756 = vmatprep.subr.bf16.mxu0 %v3118_v0 }
 0x45e   : > { %v1672_v14 = vpop.xlane.xlu0 %1671 }
 0x45f   : > { %2916 = vrcp.f32 %v1672_v14 }
 0x460   : > { %v1669_v37 = vpop.xlane.xlu1 %1668 }
 0x461   : > { %2918 = vrcp.f32 %v1669_v37 }
 0x462   : > { %v1675_v39 = vpop.xlane.xlu0 %1674 }
 0x463   : > { %2920 = vrcp.f32 %v1675_v39 }
 0x464   : > { %v1678_v43 = vpop.xlane.xlu1 %1677 }
 0x465   : > { %2922 = vrcp.f32 %v1678_v43 }
 0x466   : > { %v1681_v49 = vpop.xlane.xlu0 %1680 }
 0x468   : > { %v1684_v47 = vpop.xlane.xlu1 %1683 }
 0x469   : > { %2924 = vrcp.f32 %v1684_v47 }
 0x46a   : > { %2926 = vrcp.f32 %v1681_v49 }
 0x46c   : > { %v2917_v52 = vpop.eup %2916 }
 0x46d   : > { %v1696_v16 = vmul.f32 %v2917_v52, %v3530_v50  ;;  %v1898_v50 = vsel %vm1712_vm4, %v1222_v61, 0 }
 0x46e   : > { %v2919_v54 = vpop.eup %2918 }
 0x46f   : > { %v1704_v57 = vpack.c.bf16 %v1696_v16, %v1696_v16  ;;  %v1695_v59 = vmul.f32 %v2919_v54, %v3532_v56  ;;  %v1229_v56 = vshrl.u32 %v1182_v63, 16 }
 0x470   : > { %v2921_v2 = vpop.eup %2920 }
 0x471   : > { %2747 = vmatmul.mubr.msk.bf16.vlgmr.msra.gmra.mxu0 %vm1232_vm2, %v1704_v57  ;;  %v1703_v4 = vpack.c.bf16 %v1695_v59, %v1695_v59  ;;  %v1231_v33 = vpack.i.b16 %v1230_v5, %v1229_v56  ;;  %v1697_v8 = vmul.f32 %v2921_v2, %v3536_v58 }
 0x472   : > { %v2923_v7 = vpop.eup %2922  ;;  %2757 = vmatpush3.bf16.msra.mxu0 %v1944_v3  ;;  %2758 = vmatprep.mubr.msk.bf16.mxu0 %vm3119_vm0, %v3118_v0 }
 0x473   : > { %2741 = vmatmul.mubr.msk.bf16.vlgmr.msra.gmra.mxu1 %vm1232_vm2, %v1703_v4  ;;  %2768 = vmatprep.subr.bf16.mxu0 %v3118_v0  ;;  %v1698_v41 = vmul.f32 %v2923_v7, %v3540_v60  ;;  %v2036_v55 = vsel %vm1712_vm4, %v1231_v33, 0  ;;  %v1705_v12 = vpack.c.bf16 %v1697_v8, %v1697_v8  ;;  %v1990_v60 = vsel %vm1712_vm4, %v1228_v9, 0 }
 0x474   : > { %2751 = vmatpush3.bf16.msra.mxu1 %v1898_v50  ;;  %2752 = vmatprep.mubr.msk.bf16.mxu1 %vm3119_vm0, %v3118_v0 }
 0x475   : > { %2762 = vmatprep.subr.bf16.mxu1 %v3118_v0  ;;  %v1706_v36 = vpack.c.bf16 %v1698_v41, %v1698_v41 }
 0x476   : > { %v2925_v10 = vpop.eup %2924 }
 0x477   : > { %v2927_v17 = vpop.eup %2926  ;;  %v1700_v19 = vmul.f32 %v2925_v10, %v3548_v1 }
 0x478   : > { %v1699_v58 = vmul.f32 %v2927_v17, %v3544_v62 }
 0x479   : > { %2759 = vmatmul.mubr.msk.bf16.vlgmr.msra.gmra.mxu0 %vm1232_vm2, %v1706_v36  ;;  %v1708_v6 = vpack.c.bf16 %v1700_v19, %v1700_v19 }
 0x47a   : > { %2769 = vmatpush3.bf16.msra.mxu0 %v2036_v55  ;;  %2770 = vmatprep.mubr.msk.bf16.mxu0 %vm3119_vm0, %v3118_v0  ;;  %v1707_v18 = vpack.c.bf16 %v1699_v58, %v1699_v58 }
 0x47b   : > { %2753 = vmatmul.mubr.msk.bf16.vlgmr.msra.gmra.mxu1 %vm1232_vm2, %v1705_v12 }
 0x47c   : > { %2763 = vmatpush3.bf16.msra.mxu1 %v1990_v60  ;;  %2764 = vmatprep.mubr.msk.bf16.mxu1 %vm3119_vm0, %v3118_v0 }
 0x47d   : > { %2774 = vmatprep.subr.bf16.mxu1 %v3118_v0 }
 0x481   : > { %2771 = vmatmul.mubr.msk.bf16.vlgmr.msra.gmra.mxu0 %vm1232_vm2, %v1708_v6 }
 0x483   : > { %2765 = vmatmul.mubr.msk.bf16.vlgmr.msra.gmra.mxu1 %vm1232_vm2, %v1707_v18 }
 0x484   : > { %2778 = vmatprep.mubr.msk.bf16.mxu1 %vm3119_vm0, %v3118_v0 }
 0x508   : > { %v1750_v20 = vpop.f32.mrf.mxu1 }
 0x50a   : > { %v2730_v21 = vpop.f32.mrf.mxu1  ;;  %v1796_v1 = vpop.f32.mrf.mxu0 }
 0x50c   : > { %v1753_v22 = vpop.f32.mrf.mxu1  ;;  %v2736_v23 = vpop.f32.mrf.mxu0 }
 0x50e   : > { %v2731_v24 = vpop.f32.mrf.mxu1  ;;  %v1799_v25 = vpop.f32.mrf.mxu0 }
 0x510   : > { %v2737_v26 = vpop.f32.mrf.mxu0 }
 0x531   : > { %v1888_v62 = vpop.f32.mrf.mxu0 }
 0x532   : > { %v2094_v42 = vcombine.low %v1796_v1, %v1888_v62  ;;  %v2095_v11 = vcombine.high %v1796_v1, %v1888_v62 }
 0x533   : > { %v1842_v27 = vpop.f32.mrf.mxu1  ;;  %v2748_v28 = vpop.f32.mrf.mxu0 }
 0x534   : > { %v2078_v29 = vcombine.low %v1750_v20, %v1842_v27  ;;  %v2079_v31 = vcombine.high %v1750_v20, %v1842_v27  ;;  %v2102_v14 = vrot.slane %v2094_v42, %v3362_v30  ;;  %v2109_v13 = vrot.slane %v2095_v11, %v3362_v30 }
 0x535   : > { %v2742_v32 = vpop.f32.mrf.mxu1  ;;  %v1891_v34 = vpop.f32.mrf.mxu0 }
 0x536   : > { %v2086_v35 = vrot.slane %v2078_v29, %v3362_v30  ;;  %v2093_v37 = vrot.slane %v2079_v31, %v3362_v30 }
 0x537   : > { %v1845_v38 = vpop.f32.mrf.mxu1  ;;  %v2749_v39 = vpop.f32.mrf.mxu0 }
 0x538   : > { %v2110_v40 = vcombine.low %v2086_v35, %v2102_v14  ;;  %v2111_v43 = vcombine.high %v2086_v35, %v2102_v14  ;;  %v2126_v45 = vcombine.low %v2093_v37, %v2109_v13  ;;  %v2127_v46 = vcombine.high %v2093_v37, %v2109_v13  ;;  %v2894_v39 = vld [vmem:[#allocation8 + $0x8] sm:$0xff]  }
 0x539   : > { %v2743_v47 = vpop.f32.mrf.mxu1  ;;  %v1980_v48 = vpop.f32.mrf.mxu0  ;;  %2775 = vmatpush3.bf16.msra.mxu1 %v2894_v39 }
 0x53a   : > { %v2118_v49 = vrot.slane %v2110_v40, %v3381_v44  ;;  %v2125_v51 = vrot.slane %v2111_v43, %v3381_v44  ;;  %v2134_v52 = vrot.slane %v2126_v45, %v3381_v44  ;;  %v2141_v16 = vrot.slane %v2127_v46, %v3381_v44  ;;  %2776 = vmatprep.subr.bf16.mxu1 %v3118_v0 }
 0x53b   : > { %v1934_v53 = vpop.f32.mrf.mxu1  ;;  %v2760_v15 = vpop.f32.mrf.mxu0 }
 0x53c   : > { %v2214_v54 = vcombine.low %v2118_v49, %v2125_v51  ;;  %v2617_v57 = vcombine.high %v2118_v49, %v2125_v51  ;;  %v2230_v59 = vcombine.low %v2134_v52, %v2141_v16  ;;  %v2618_v61 = vcombine.high %v2134_v52, %v2141_v16 }
 0x53d   : > { %v2754_v63 = vpop.f32.mrf.mxu1  ;;  %v1983_v2 = vpop.f32.mrf.mxu0 }
 0x53e   : > { %v2221_v3 = vrot.slane %v2214_v54, %v3362_v30  ;;  %v2229_v4 = vrot.slane %v2617_v57, %v3362_v30  ;;  %v2237_v5 = vrot.slane %v2230_v59, %v3362_v30  ;;  %v2245_v7 = vrot.slane %v2618_v61, %v3362_v30 }
 0x53f   : > { %v1937_v50 = vpop.f32.mrf.mxu1  ;;  %v2761_v41 = vpop.f32.mrf.mxu0 }
 0x540   : > { %v2246_v56 = vcombine.low %v2221_v3, %v2229_v4  ;;  %v2262_v33 = vcombine.low %v2237_v5, %v2245_v7  ;;  %v2247_v34 = vcombine.high %v2221_v3, %v2229_v4  ;;  %v2263_v14 = vcombine.high %v2237_v5, %v2245_v7 }
 0x541   : > { %v2755_v8 = vpop.f32.mrf.mxu1  ;;  %v2072_v36 = vpop.f32.mrf.mxu0 }
 0x542   : > { %v2162_v9 = vcombine.low %v1980_v48, %v2072_v36  ;;  %v2163_v10 = vcombine.high %v1980_v48, %v2072_v36  ;;  %v3660_v17 = vrot.slane %v2246_v56, %v3381_v44  ;;  %v3663_v60 = vrot.slane %v2262_v33, %v3381_v44 }
 0x543   : > { %v2026_v55 = vpop.f32.mrf.mxu1  ;;  %v2772_v12 = vpop.f32.mrf.mxu0  ;;  %v2261_v47 = vrot.slane %v2247_v34, %v3381_v44  ;;  %v2277_v48 = vrot.slane %v2263_v14, %v3381_v44 }
 0x544   : > { %v2146_v19 = vcombine.low %v1934_v53, %v2026_v55  ;;  %v2147_v58 = vcombine.high %v1934_v53, %v2026_v55  ;;  %v2278_v20 = vcombine.low %v3660_v17, %v3663_v60  ;;  %v2170_v21 = vrot.slane %v2162_v9, %v3362_v30 }
 0x545   : > { %v2766_v6 = vpop.f32.mrf.mxu1  ;;  %v2075_v18 = vpop.f32.mrf.mxu0  ;;  %v2177_v1 = vrot.slane %v2163_v10, %v3362_v30  ;;  %v2280_v59 = vcombine.low %v2261_v47, %v2277_v48  ;;  %v2279_v63 = vcombine.high %v3660_v17, %v3663_v60  ;;  %v2281_v7 = vcombine.high %v2261_v47, %v2277_v48  ;;  %v2621_v17 = vld [vmem:[%s3759_s5] ss:$0 sm:$0xff] }
 0x546   : > { %v2154_v22 = vrot.slane %v2146_v19, %v3362_v30  ;;  %v2161_v23 = vrot.slane %v2147_v58, %v3362_v30 }
 0x547   : > { %v2029_v24 = vpop.f32.mrf.mxu1  ;;  %v2773_v25 = vpop.f32.mrf.mxu0 }
 0x548   : > { %v2178_v26 = vcombine.low %v2154_v22, %v2170_v21  ;;  %v2179_v62 = vcombine.high %v2154_v22, %v2170_v21  ;;  %v2194_v42 = vcombine.low %v2161_v23, %v2177_v1  ;;  %v2195_v11 = vcombine.high %v2161_v23, %v2177_v1  ;;  %v2928_v23 = vld [vmem:[%s3309_s14] sm:$0xff] }
 0x549   : > { %v2767_v27 = vpop.f32.mrf.mxu1 }
 0x54a   : > { %v2186_v28 = vrot.slane %v2178_v26, %v3381_v44  ;;  %v2193_v29 = vrot.slane %v2179_v62, %v3381_v44  ;;  %v2202_v31 = vrot.slane %v2194_v42, %v3381_v44  ;;  %v2209_v32 = vrot.slane %v2195_v11, %v3381_v44  ;;  %v2929_v42 = vld [vmem:[%s3309_s14 + $0x8] sm:$0xff] }
 0x54c   : > { %v2282_v13 = vcombine.low %v2186_v28, %v2193_v29  ;;  %v2619_v35 = vcombine.high %v2186_v28, %v2193_v29  ;;  %v2298_v37 = vcombine.low %v2202_v31, %v2209_v32  ;;  %v2620_v38 = vcombine.high %v2202_v31, %v2209_v32 }
 0x54e   : > { %v2289_v40 = vrot.slane %v2282_v13, %v3362_v30  ;;  %v2297_v43 = vrot.slane %v2619_v35, %v3362_v30  ;;  %v2305_v45 = vrot.slane %v2298_v37, %v3362_v30  ;;  %v2313_v46 = vrot.slane %v2620_v38, %v3362_v30  ;;  %v2895_v30 = vld [vmem:[#allocation8] sm:$0xff]  }
 0x54f   : > { %2777 = vmatpush3.bf16.msra.mxu1 %v2895_v30 }
 0x550   : > { %v2315_v49 = vcombine.high %v2289_v40, %v2297_v43  ;;  %v2331_v51 = vcombine.high %v2305_v45, %v2313_v46  ;;  %v2314_v52 = vcombine.low %v2289_v40, %v2297_v43  ;;  %v2330_v16 = vcombine.low %v2305_v45, %v2313_v46 }
 0x552   : > { %v2329_v53 = vrot.slane %v2315_v49, %v3381_v44  ;;  %v2345_v15 = vrot.slane %v2331_v51, %v3381_v44  ;;  %v2322_v54 = vrot.slane %v2314_v52, %v3381_v44  ;;  %v2338_v57 = vrot.slane %v2330_v16, %v3381_v44 }
 0x554   : > { %v2348_v61 = vcombine.low %v2329_v53, %v2345_v15  ;;  %v2347_v2 = vcombine.high %v2322_v54, %v2338_v57  ;;  %v2346_v3 = vcombine.low %v2322_v54, %v2338_v57  ;;  %v2349_v0 = vcombine.high %v2329_v53, %v2345_v15 }
 0x556   : > { %v2882_v4 = vpack.i.bf16 %v2348_v61, %v2280_v59  ;;  %v2877_v5 = vpack.i.bf16 %v2347_v2, %v2279_v63  ;;  %v2887_v50 = vpack.i.bf16 %v2349_v0, %v2281_v7 }
 0x558   : > { %2883 = vrot.lane.b32.xlu1 %v2882_v4, %s3128_s19  ;;  %2878 = vrot.lane.b32.xlu0 %v2877_v5, %s3129_s9  ;;  %s3040_s19 = sshll.u32 %s3131_s17, 4  ;;  %s3041_s19 = int_to_ptr.vmem [resolvable:$false] %s3040_s19 }
 0x559   : > { %p3043_p13 = scmp.lt.s32.totalorder %s3709_s18, %s3041_s19 }
 0x55c   : > { %2888 = vrot.lane.b32.xlu1 %v2887_v50, %s3130_s7  ;;  %s3042_s7 = scalar_lea.vmem %s3041_s19, 512 }
 0x55d   : > { %p3044_p0 = scmp.lt.s32.totalorder %s3042_s7, %s3036_s12 }
 0x55f   : > { %p3045_p1 = por %p3044_p0, %p3043_p13 }
 0x561   : > { %p3046_p3 = pnand %p3045_p1, %p3039_p10 }
 0x5ca   : > { %v2884_v44 = vpop.permute.xlu1 %2883  ;;  %v2879_v41 = vpop.permute.xlu0 %2878 }
 0x5cb   : > { %v2881_v56 = vunpack.i.h.bf16 %v2879_v41  ;;  %v2880_v33 = vunpack.i.l.bf16 %v2879_v41  ;;  %v2886_v8 = vunpack.i.h.bf16 %v2884_v44  ;;  %v2885_v36 = vunpack.i.l.bf16 %v2884_v44 }
 0x5cd   : > { %v2374_v9 = vsel %vm1232_vm2, %v2278_v20, %v2880_v33  ;;  %v2375_v10 = vsel %vm1232_vm2, %v2346_v3, %v2881_v56 }
 0x5ce   : > { %v2889_v55 = vpop.permute.xlu1 %2888  ;;  %v2377_v58 = vsel %vm2376_vm5, %v2374_v9, %v2885_v36  ;;  %v2378_v6 = vsel %vm2376_vm5, %v2375_v10, %v2886_v8 }
 0x5cf   : > { %v2891_v12 = vunpack.i.h.bf16 %v2889_v55  ;;  %v2890_v19 = vunpack.i.l.bf16 %v2889_v55 }
 0x5d1   : > { %v2380_v18 = vsel %vm2379_vm6, %v2377_v58, %v2890_v19  ;;  %v2381_v21 = vsel %vm2379_vm6, %v2378_v6, %v2891_v12 }
 0x5d2   : > { %v2382_v1 = vpack.c.bf16 %v2381_v21, %v2380_v18 }
 0x5d4   : > { %2779 = vmatmul.mubr.msk.bf16.vlgmr.msra.gmra.mxu1 %vm341_vm1, %v2382_v1 }
 0x694   : > { %v2443_v60 = vpop.f32.mrf.mxu1 }
 0x695   : > { %v2444_v20 = vadd.f32 %v2621_v17, %v2443_v60 }
 0x696   : > { %v2780_v22 = vpop.f32.mrf.mxu1 }
 0x697   : > { %v2450_v24 = vadd.f32 %v2928_v23, %v2444_v20 }
 0x698   : > { %v2446_v25 = vpop.f32.mrf.mxu1 }
 0x699   : > { %2452 = vst.msk [vmem:[%s311_s29] sm:$0xff] %vm341_vm1, %v2450_v24  ;;  %v2447_v26 = vadd.f32 %v2621_v17, %v2446_v25 }
 0x69a   : > { %v2781_v62 = vpop.f32.mrf.mxu1 }
 0x69b   : > { %v2451_v11 = vadd.f32 %v2929_v42, %v2447_v26 }
 0x69d   : > { %2453 = vst.msk [vmem:[%s311_s29 + $0x8] sm:$0xff] %vm341_vm1, %v2451_v11 }
 0x69e   : > { %3049 = shalt.err (!%p3046_p3)
}
 0x69f   : > { %s3050_s14 = scalar_lea.hbm %s3706_s30, 256  ;;  %s3054_s27 = scalar_lea.hbm %s3760_s6, 512 }
 0x6a0   : > { %p3051_p2 = scmp.ne.s32.totalorder %s3706_s30, %s3050_s14  ;;  %p3055_p5 = scmp.lt.s32.totalorder %s3706_s30, %s3760_s6 }
 0x6a1   : > { %p3056_p4 = scmp.lt.s32.totalorder %s3054_s27, %s3050_s14 }
 0x6a2   : > { %p3052_p9 = pnand %p3051_p2, %p3778_p12 }
 0x6a3   : > { %p3057_p6 = por %p3056_p4, %p3055_p5 }
 0x6a4   : > { %p3053_p11 = pneg %p3052_p9 }
 0x6a6   : > { %p3058_p8 = pnand %p3057_p6, %p3053_p11 }
 0x6a8   : > { %3061 = shalt.err (!%p3058_p8)
}
 0x6a9   : > { %s3132_s26 = smov 128  }
 0x6aa   : > { %2796 = dma.vmem_to_hbm [thread:$0]  (%p3778_p12), %s3709_s18, 256, %s3706_s30, %s2455_s25, %s3132_s26, %s3132_s26, %s3129_s9  }
 0x6ab PF: > { %s2483_s12 = sand.u32 1, %s3096_s21   ;;  %p3779_p7 = scmp.ne.s32.totalorder %s3766_s28, 0 }
 0x6ac   : > { %p3780_p10 = scmp.ge.s32.totalorder %s3108_s24, 2  ;;  %s2484_s17 = scalar_lea.sflag [#allocation4], %s2483_s12 }
 0x6ae   : > { %p2813_p13 = pnand %p3780_p10, %p3779_p7 }
 0x6b0   : > { %p2814_p0 = pneg %p2813_p13 }
 0x6b2   : > { %3091 = dma.done.wait (%p2814_p0), %s2484_s17, 256  }
 0x6b3   : > { %3093 = vsyncadd (%p2814_p0), %s2484_s17, 4294967040  ;;  %p21_p1 = scmp.ge.s32.totalorder %s3248_s8, 4   ;;  %s3781_s21 = smov %s3100_s22 }
 0x6b4   : > { %s3782_s22 = smov %s3104_s23  ;;  %s3783_s23 = smov %s3258_s11 }
 0x6b5   : > { %s3784_s24 = smov %s3248_s8  ;;  %23 = sbr.rel (!%p21_p1) target bundleno = 7 (0x7), region = 101 }
 0x6ba   :  { %2489 = vsyncpa [#allocation3], 1 }
 0x6bb   :  { %2491 = vsyncpa [#allocation3 + $0x1], 1 }
 0x6bc   :  { %2492 = vsyncpa [#allocation6], 1 }
 0x6bd   :  { %2493 = vsyncpa [#allocation9], 1 }
 0x6be   :  { %2494 = vsyncpa [#allocation4], 1 }
 0x6bf   :  { %2496 = vsyncpa [#allocation4 + $0x1], 1 }

</bundles_post_ra>
